<compile_context>
chip_gen: v7x
topology: tpu7x:2x2x1
jax: 0.10.0
libtpu: 0.0.40
codegen_flags: <defaults>
</compile_context>

<pallas_src>
import functools

import jax
import jax.numpy as jnp
from jax import lax
from jax.experimental import pallas as pl
from jax.experimental.pallas import tpu as pltpu


def _round_up(x, m):
    return ((x + m - 1) // m) * m


def _pick_tile(dim, *, sublane=False):
    """Pick a tile size: as large as 512 when the dim allows (fewer grid steps,
    lane-dense stores); otherwise fall back to the full (small) dim."""
    for c in (512, 256, 128):
        if dim >= c:
            return c
    # dim < 128: second-minor dims only need a multiple of 8; lane/contraction
    # dims may use the full array extent (full-dim exemption).
    return _round_up(dim, 8) if sublane else dim


def _pick_bb(B, target=256):
    """Batch block for the recurrence: big enough to feed full MXU rows,
    while keeping >= 2 blocks (v7x megacore) when the batch is large."""
    Bp = _round_up(B, 8)
    if Bp <= target:
        return Bp
    bb = target
    while pl.cdiv(B, bb) < 2 and bb > 8:
        bb //= 2
    return bb


def _recurrence_blocks(B, T, Hp, in_size, out_size,
                       vmem_budget=12 * 1024 * 1024):
    """Pick (tc, bb) for the recurrence under a conservative VMEM budget
    (double-buffered xg/hout blocks + 2x W_hh + h/c scratch)."""
    bb = _pick_bb(B)
    tc = min(16, max(T, 1))

    def bytes_needed(tc_, bb_):
        return (2 * tc_ * bb_ * 4 * Hp * in_size      # xg double-buffer
                + 2 * tc_ * bb_ * Hp * out_size       # hout double-buffer
                + 2 * Hp * 4 * Hp * in_size           # W_hh double-buffer
                + 2 * bb_ * Hp * 4)                   # h/c f32 scratch

    while bytes_needed(tc, bb) > vmem_budget and tc > 1:
        tc = max(1, tc // 2)
    while bytes_needed(tc, bb) > vmem_budget and bb > 8:
        bb = max(8, bb // 2)
    return min(tc, T), bb


def _sigmoid(x):
    # One EUP push (tanh) instead of exp + reciprocal.
    return 0.5 * jnp.tanh(0.5 * x) + 0.5


# ----------------------------------------------------------------------------
# Generic tiled matmul-with-bias kernel:  out = a @ b + bias
# ----------------------------------------------------------------------------
def matmul_bias_kernel(a_ref, b_ref, bias_ref, o_ref, acc_ref):
    @pl.when(pl.program_id(2) == 0)
    def _():
        acc_ref[...] = jnp.zeros_like(acc_ref)

    acc_ref[...] += jnp.dot(a_ref[...], b_ref[...],
                            preferred_element_type=jnp.float32)

    @pl.when(pl.program_id(2) == pl.num_programs(2) - 1)
    def _():
        o_ref[...] = (acc_ref[...] + bias_ref[...]).astype(o_ref.dtype)


def pallas_linear(x, w, bias, *, out_dtype=jnp.float32):
    """x:(M,K) @ w:(K,N) + bias:(1,N) -> (M,N) via a tiled Pallas matmul."""
    M, K = x.shape
    _, N = w.shape
    tm = _pick_tile(M, sublane=True)
    tk = _pick_tile(K)
    tn = _pick_tile(N)
    Mp, Kp, Np = _round_up(M, tm), _round_up(K, tk), _round_up(N, tn)

    if (Mp, Kp) != (M, K):
        x = jnp.pad(x, ((0, Mp - M), (0, Kp - K)))
    if (Kp, Np) != (K, N):
        w = jnp.pad(w, ((0, Kp - K), (0, Np - N)))
    if Np != N:
        bias = jnp.pad(bias, ((0, 0), (0, Np - N)))
    bias = bias.astype(jnp.float32)

    cost = pl.CostEstimate(
        flops=2 * Mp * Np * Kp,
        transcendentals=0,
        bytes_accessed=int(x.size * x.dtype.itemsize
                           + w.size * w.dtype.itemsize
                           + bias.size * 4
                           + Mp * Np * jnp.dtype(out_dtype).itemsize))

    out = pl.pallas_call(
        matmul_bias_kernel,
        out_shape=jax.ShapeDtypeStruct((Mp, Np), out_dtype),
        grid_spec=pltpu.PrefetchScalarGridSpec(
            num_scalar_prefetch=0,
            grid=(Mp // tm, Np // tn, Kp // tk),
            in_specs=[
                pl.BlockSpec((tm, tk), lambda i, j, k: (i, k)),
                pl.BlockSpec((tk, tn), lambda i, j, k: (k, j)),
                pl.BlockSpec((1, tn), lambda i, j, k: (0, j)),
            ],
            out_specs=pl.BlockSpec((tm, tn), lambda i, j, k: (i, j)),
            scratch_shapes=[pltpu.VMEM((tm, tn), jnp.float32)],
        ),
        compiler_params=pltpu.CompilerParams(
            dimension_semantics=("parallel", "parallel", "arbitrary")),
        cost_estimate=cost,
    )(x, w, bias)

    if (Mp, Np) != (M, N):
        out = out[:M, :N]
    return out


# ----------------------------------------------------------------------------
# Sequential LSTM recurrence kernel (input gates precomputed).
# ----------------------------------------------------------------------------
def lstm_recurrence_kernel(xg_ref, whh_ref, hout_ref, h_ref, c_ref):
    """Processes `tc` time steps for one batch block per grid step.

    xg_ref:   (tc, bb, 4Hp)  precomputed x_t @ W_ih^T + (b_ih + b_hh)
    whh_ref:  (Hp, 4Hp)      hidden->gates weights (transposed, per-gate padded)
    hout_ref: (tc, bb, Hp)   hidden states h_t for this block (time-major)
    h_ref/c_ref: (bb, Hp)    recurrent state carried across the time grid axis.

    NOTE: state carry relies on the grid order being (batch outer "parallel",
    time inner "arbitrary"); do not reorder the grid axes.
    """
    @pl.when(pl.program_id(1) == 0)          # first time-block of this batch block
    def _():
        h_ref[...] = jnp.zeros_like(h_ref)
        c_ref[...] = jnp.zeros_like(c_ref)

    tc = xg_ref.shape[0]
    Hp = h_ref.shape[1]
    whh = whh_ref[...]                        # hoisted: loaded once per grid step

    # Static unroll over the (small) time block: every index is a compile-time
    # constant -> lane/sublane-dense loads and stores.
    for i in range(tc):
        gates = xg_ref[i].astype(jnp.float32) + jnp.dot(
            h_ref[...].astype(whh.dtype), whh,
            preferred_element_type=jnp.float32)
        i_g = _sigmoid(gates[:, 0 * Hp:1 * Hp])
        f_g = _sigmoid(gates[:, 1 * Hp:2 * Hp])
        g_g = jnp.tanh(gates[:, 2 * Hp:3 * Hp])
        o_g = _sigmoid(gates[:, 3 * Hp:4 * Hp])
        c_new = f_g * c_ref[...] + i_g * g_g
        h_new = o_g * jnp.tanh(c_new)
        c_ref[...] = c_new
        h_ref[...] = h_new
        hout_ref[i] = h_new.astype(hout_ref.dtype)


# ----------------------------------------------------------------------------
# Parameter preparation: pre-transpose and pad E, H (per gate) to lane multiples.
# Padding is exact: padded gate columns see zero weights/bias, so padded h/c
# entries stay identically zero and never pollute the real outputs.
# ----------------------------------------------------------------------------
def prepare_decoder_params(raw, *, lane=128):
    H4, E = raw["wih"].shape
    H = H4 // 4
    Ep, Hp = _round_up(E, lane), _round_up(H, lane)

    def pad_gated(w, in_dim, in_pad):
        # w: (4H, in_dim) -> per-gate padded & transposed: (in_pad, 4*Hp)
        w = w.reshape(4, H, in_dim)
        w = jnp.pad(w, ((0, 0), (0, Hp - H), (0, in_pad - in_dim)))
        return jnp.transpose(w, (2, 0, 1)).reshape(in_pad, 4 * Hp)

    b = (raw["b_ih"] + raw["b_hh"]).reshape(4, H)
    b = jnp.pad(b, ((0, 0), (0, Hp - H))).reshape(1, 4 * Hp)

    return {
        "embed": jnp.pad(raw["embed"], ((0, 0), (0, Ep - E))),      # (V, Ep)
        "wih_t": pad_gated(raw["wih"], E, Ep),                       # (Ep, 4Hp)
        "whh_t": pad_gated(raw["whh"], H, Hp),                       # (Hp, 4Hp)
        "b": b,                                                      # (1, 4Hp)
        "wout_t": jnp.pad(raw["w_lin"].T, ((0, Hp - H), (0, 0))),    # (Hp, V)
        "bout": raw["b_lin"][None, :],                               # (1, V)
    }


# ----------------------------------------------------------------------------
# Forward pass (mirrors DecoderRNN.forward(features, captions)).
# ----------------------------------------------------------------------------
def decoder_rnn_forward(features, captions, params, *,
                        compute_dtype=jnp.float32, tc=None, bb=None):
    """features: (B, E) f32, captions: (B, T) int32 -> logits (B, T, V) f32."""
    embed = params["embed"]
    Ep = embed.shape[1]
    Hp = params["whh_t"].shape[0]
    V = params["wout_t"].shape[1]

    # --- glue (plain JAX): embedding gather + concat image feature ---
    emb = jnp.take(embed, captions[:, :-1], axis=0)               # (B, T-1, Ep)
    feat = features
    if feat.shape[1] != Ep:
        feat = jnp.pad(feat, ((0, 0), (0, Ep - feat.shape[1])))
    x = jnp.concatenate([feat[:, None, :], emb], axis=1)          # (B, T, Ep)
    B, T, _ = x.shape

    # time-major for the recurrence; this transpose moves the SMALL (B,T,Ep)
    # tensor (not the logits).
    x = jnp.transpose(x, (1, 0, 2)).astype(compute_dtype)         # (T, B, Ep)

    in_size = jnp.dtype(compute_dtype).itemsize
    a_tc, a_bb = _recurrence_blocks(B, T, Hp, in_size, in_size)
    tc = a_tc if tc is None else min(tc, T)
    bb = a_bb if bb is None else bb

    T_pad, B_pad = _round_up(T, tc), _round_up(B, bb)
    if (T_pad, B_pad) != (T, B):
        # Padded rows/steps run the LSTM on zeros (wasted but discarded work).
        x = jnp.pad(x, ((0, T_pad - T), (0, B_pad - B), (0, 0)))

    # (1) Hoisted input projection: one big MXU matmul over ALL time steps,
    #     combined LSTM bias folded in.  Stored in compute_dtype (bf16 path
    #     halves the HBM traffic the recurrence has to read).
    xg = pallas_linear(x.reshape(T_pad * B_pad, Ep),
                       params["wih_t"].astype(compute_dtype),
                       params["b"], out_dtype=compute_dtype)
    xg = xg.reshape(T_pad, B_pad, 4 * Hp)

    # (2) Sequential recurrence: only h_{t-1} @ W_hh^T + nonlinearities remain
    #     per step; tc steps per grid iteration; batch blocks run in parallel.
    nb, nt = B_pad // bb, T_pad // tc
    whh = params["whh_t"].astype(compute_dtype)
    cost = pl.CostEstimate(
        flops=2 * T_pad * B_pad * Hp * 4 * Hp + 12 * T_pad * B_pad * Hp,
        transcendentals=5 * T_pad * B_pad * Hp,
        bytes_accessed=int(xg.size * in_size + whh.size * in_size
                           + T_pad * B_pad * Hp * in_size))

    hout = pl.pallas_call(
        lstm_recurrence_kernel,
        out_shape=jax.ShapeDtypeStruct((T_pad, B_pad, Hp), compute_dtype),
        grid_spec=pltpu.PrefetchScalarGridSpec(
            num_scalar_prefetch=0,
            grid=(nb, nt),   # batch outer ("parallel"), time inner ("arbitrary")
            in_specs=[
                pl.BlockSpec((tc, bb, 4 * Hp), lambda b, t: (t, b, 0)),  # xgates
                # W_hh has a constant index_map; at large H store it bf16
                # (compute_dtype) to keep its pipeline buffers small.
                pl.BlockSpec((Hp, 4 * Hp), lambda b, t: (0, 0)),
            ],
            out_specs=pl.BlockSpec((tc, bb, Hp), lambda b, t: (t, b, 0)),
            scratch_shapes=[
                pltpu.VMEM((bb, Hp), jnp.float32),                       # h state
                pltpu.VMEM((bb, Hp), jnp.float32),                       # c state
            ],
        ),
        compiler_params=pltpu.CompilerParams(
            dimension_semantics=("parallel", "arbitrary")),
        cost_estimate=cost,
    )(xg, whh)

    # (3) Hoisted output projection: transpose only the SMALL hidden states to
    #     batch-first, then one lane-dense (B*T, Hp) @ (Hp, V) matmul -> logits
    #     already in (B, T, V) layout (no big transpose of the logits tensor).
    h_bt = jnp.transpose(hout[:T, :B], (1, 0, 2)).reshape(B * T, Hp)
    logits = pallas_linear(h_bt,
                           params["wout_t"].astype(compute_dtype),
                           params["bout"], out_dtype=jnp.float32)
    return logits.reshape(B, T, V)


# ----------------------------------------------------------------------------
# Pure-JAX reference (same semantics as the PyTorch module), unpadded params.
# ----------------------------------------------------------------------------
def reference_forward(features, captions, raw):
    emb = jnp.take(raw["embed"], captions[:, :-1], axis=0)
    x = jnp.concatenate([features[:, None, :], emb], axis=1)      # (B, T, E)
    x = jnp.transpose(x, (1, 0, 2))                               # (T, B, E)
    B = x.shape[1]
    H = raw["whh"].shape[1]
    wih_t, whh_t = raw["wih"].T, raw["whh"].T
    b = raw["b_ih"] + raw["b_hh"]
    wout_t, bout = raw["w_lin"].T, raw["b_lin"]

    def step(carry, x_t):
        h, c = carry
        gates = x_t @ wih_t + h @ whh_t + b
        i_g = jax.nn.sigmoid(gates[:, 0 * H:1 * H])
        f_g = jax.nn.sigmoid(gates[:, 1 * H:2 * H])
        g_g = jnp.tanh(gates[:, 2 * H:3 * H])
        o_g = jax.nn.sigmoid(gates[:, 3 * H:4 * H])
        c_new = f_g * c + i_g * g_g
        h_new = o_g * jnp.tanh(c_new)
        return (h_new, c_new), h_new @ wout_t + bout

    init = (jnp.zeros((B, H), jnp.float32), jnp.zeros((B, H), jnp.float32))
    _, ys = lax.scan(step, init, x)
    return jnp.transpose(ys, (1, 0, 2))


def init_params(key, embed_size, hidden_size, vocab_size):
    ks = jax.random.split(key, 7)
    s = 0.1
    # PyTorch shapes: weight_ih (4H, E), weight_hh (4H, H), linear.weight (V, H).
    return {
        "embed": jax.random.normal(ks[0], (vocab_size, embed_size), jnp.float32) * s,
        "wih": jax.random.normal(ks[1], (4 * hidden_size, embed_size), jnp.float32) * s,
        "whh": jax.random.normal(ks[2], (4 * hidden_size, hidden_size), jnp.float32) * s,
        "b_ih": jax.random.normal(ks[3], (4 * hidden_size,), jnp.float32) * s,
        "b_hh": jax.random.normal(ks[4], (4 * hidden_size,), jnp.float32) * s,
        "w_lin": jax.random.normal(ks[5], (vocab_size, hidden_size), jnp.float32) * s,
        "b_lin": jax.random.normal(ks[6], (vocab_size,), jnp.float32) * s,
    }


if __name__ == "__main__":
    # Small shapes consistent with DecoderRNN.forward:
    #   features: (B, embed_size), captions: (B, T_cap) int ids
    B, T_cap = 2, 8
    embed_size, hidden_size, vocab_size = 16, 32, 32

    key = jax.random.PRNGKey(0)
    k_feat, k_cap, k_par = jax.random.split(key, 3)

    features = jax.random.normal(k_feat, (B, embed_size), jnp.float32)
    captions = jax.random.randint(k_cap, (B, T_cap), 0, vocab_size, jnp.int32)
    raw = init_params(k_par, embed_size, hidden_size, vocab_size)
    params = prepare_decoder_params(raw)

    ref = reference_forward(features, captions, raw)

    # f32 MXU feed: tight check against the f32 reference.
    fwd = jax.jit(decoder_rnn_forward)
    out = jax.block_until_ready(fwd(features, captions, params))
    assert out.shape == (B, T_cap, vocab_size), out.shape
    assert jnp.allclose(out, ref, atol=1e-4, rtol=1e-4), \
        float(jnp.max(jnp.abs(out - ref)))

    # bf16 MXU feed (f32 accumulation + f32 h/c state): loose tolerance since
    # bf16 rounding compounds across the recurrence.
    fwd_bf16 = jax.jit(functools.partial(decoder_rnn_forward,
                                         compute_dtype=jnp.bfloat16))
    out_bf16 = jax.block_until_ready(fwd_bf16(features, captions, params))
    assert out_bf16.shape == (B, T_cap, vocab_size)
    assert float(jnp.max(jnp.abs(out_bf16 - ref))) < 1e-1

    # TODO(synk): `sample()` (greedy argmax decode with feedback) is inference-time
    # host control flow; not implemented as a kernel here.
    print("KERNEL_OK")
</pallas_src>

<mosaic_0001>
module attributes {stable_mosaic.version = 11 : i64} {
  func.func @matmul_bias_kernel(%arg0: i32, %arg1: i32, %arg2: i32, %arg3: memref<16x128xf32, #tpu.memory_space<vmem>>, %arg4: memref<128x32xf32, #tpu.memory_space<vmem>>, %arg5: memref<1x32xf32, #tpu.memory_space<vmem>>, %arg6: memref<16x32xf32, #tpu.memory_space<vmem>>, %arg7: memref<16x32xf32, #tpu.memory_space<vmem>>) attributes {dimension_semantics = [#tpu.dimension_semantics<parallel>, #tpu.dimension_semantics<parallel>, #tpu.dimension_semantics<arbitrary>], iteration_bounds = array<i64: 1, 1, 1>, scalar_prefetch = 0 : i64, scratch_operands = 1 : i64, tpu.core_type = #tpu.core_type<tc>, window_params = [{transform_indices = @transform_0, window_bounds = array<i64: 16, 128>}, {transform_indices = @transform_1, window_bounds = array<i64: 128, 32>}, {transform_indices = @transform_2, window_bounds = array<i64: 1, 32>}, {transform_indices = @transform_3, window_bounds = array<i64: 16, 32>}]} {
    %c0_i32 = arith.constant 0 : i32
    %0 = arith.cmpi eq, %arg2, %c0_i32 : i32
    %1 = arith.extui %0 : i1 to i32
    %c0_i32_0 = arith.constant 0 : i32
    %2 = arith.cmpi ne, %1, %c0_i32_0 : i32
    scf.if %2 {
      %cst_10 = arith.constant 0.000000e+00 : f32
      %12 = vector.broadcast %cst_10 : f32 to vector<16x32xf32>
      %c0_11 = arith.constant 0 : index
      %c0_12 = arith.constant 0 : index
      %13 = vector.load %arg7[%c0_11, %c0_12] : memref<16x32xf32, #tpu.memory_space<vmem>>, vector<16x32xf32>
      tpu.vector_store %arg7[%c0_11, %c0_12], %12 {strides = array<i32>} : memref<16x32xf32, #tpu.memory_space<vmem>>, vector<16x32xf32>,
    } else {
    }
    %c0 = arith.constant 0 : index
    %c0_1 = arith.constant 0 : index
    %3 = vector.load %arg7[%c0, %c0_1] : memref<16x32xf32, #tpu.memory_space<vmem>>, vector<16x32xf32>
    %c0_2 = arith.constant 0 : index
    %c0_3 = arith.constant 0 : index
    %4 = vector.load %arg3[%c0_2, %c0_3] : memref<16x128xf32, #tpu.memory_space<vmem>>, vector<16x128xf32>
    %c0_4 = arith.constant 0 : index
    %c0_5 = arith.constant 0 : index
    %5 = vector.load %arg4[%c0_4, %c0_5] : memref<128x32xf32, #tpu.memory_space<vmem>>, vector<128x32xf32>
    %cst = arith.constant dense<0.000000e+00> : vector<16x32xf32>
    %6 = tpu.matmul %4, %5, %cst {dimension_numbers = #tpu.dot_dimension_numbers<[1], [0], [0], [1], [0, 0, 1, 1], [], []>} : vector<16x128xf32>, vector<128x32xf32>, vector<16x32xf32> -> vector<16x32xf32>
    %7 = arith.addf %3, %6 : vector<16x32xf32>
    %c0_6 = arith.constant 0 : index
    %c0_7 = arith.constant 0 : index
    %8 = vector.load %arg7[%c0_6, %c0_7] : memref<16x32xf32, #tpu.memory_space<vmem>>, vector<16x32xf32>
    tpu.vector_store %arg7[%c0_6, %c0_7], %7 {strides = array<i32>} : memref<16x32xf32, #tpu.memory_space<vmem>>, vector<16x32xf32>,
    %c0_i32_8 = arith.constant 0 : i32
    %9 = arith.cmpi eq, %arg2, %c0_i32_8 : i32
    %10 = arith.extui %9 : i1 to i32
    %c0_i32_9 = arith.constant 0 : i32
    %11 = arith.cmpi ne, %10, %c0_i32_9 : i32
    scf.if %11 {
      %c0_10 = arith.constant 0 : index
      %c0_11 = arith.constant 0 : index
      %12 = vector.load %arg7[%c0_10, %c0_11] : memref<16x32xf32, #tpu.memory_space<vmem>>, vector<16x32xf32>
      %c0_12 = arith.constant 0 : index
      %c0_13 = arith.constant 0 : index
      %13 = vector.load %arg5[%c0_12, %c0_13] : memref<1x32xf32, #tpu.memory_space<vmem>>, vector<1x32xf32>
      %14 = vector.broadcast %13 : vector<1x32xf32> to vector<16x32xf32>
      %15 = arith.addf %12, %14 : vector<16x32xf32>
      %c0_14 = arith.constant 0 : index
      %c0_15 = arith.constant 0 : index
      %16 = vector.load %arg6[%c0_14, %c0_15] : memref<16x32xf32, #tpu.memory_space<vmem>>, vector<16x32xf32>
      tpu.vector_store %arg6[%c0_14, %c0_15], %15 {strides = array<i32>} : memref<16x32xf32, #tpu.memory_space<vmem>>, vector<16x32xf32>,
    } else {
    }
    return
  }
  func.func @transform_0(%arg0: i32, %arg1: i32, %arg2: i32) -> (i32, i32) {
    %c0_i32 = arith.constant 0 : i32
    return %arg0, %arg2 : i32, i32
  }
  func.func @transform_1(%arg0: i32, %arg1: i32, %arg2: i32) -> (i32, i32) {
    %c0_i32 = arith.constant 0 : i32
    return %arg2, %arg1 : i32, i32
  }
  func.func @transform_2(%arg0: i32, %arg1: i32, %arg2: i32) -> (i32, i32) {
    %c0_i32 = arith.constant 0 : i32
    %c0_i32_0 = arith.constant 0 : i32
    return %c0_i32, %arg1 : i32, i32
  }
  func.func @transform_3(%arg0: i32, %arg1: i32, %arg2: i32) -> (i32, i32) {
    %c0_i32 = arith.constant 0 : i32
    return %arg0, %arg1 : i32, i32
  }
}

module attributes {stable_mosaic.version = 11 : i64} {
  func.func @lstm_recurrence_kernel(%arg0: i32, %arg1: i32, %arg2: memref<8x8x512xf32, #tpu.memory_space<vmem>>, %arg3: memref<128x512xf32, #tpu.memory_space<vmem>>, %arg4: memref<8x8x128xf32, #tpu.memory_space<vmem>>, %arg5: memref<8x128xf32, #tpu.memory_space<vmem>>, %arg6: memref<8x128xf32, #tpu.memory_space<vmem>>) attributes {dimension_semantics = [#tpu.dimension_semantics<parallel>, #tpu.dimension_semantics<arbitrary>], iteration_bounds = array<i64: 1, 1>, scalar_prefetch = 0 : i64, scratch_operands = 2 : i64, tpu.core_type = #tpu.core_type<tc>, window_params = [{transform_indices = @transform_0, window_bounds = array<i64: 8, 8, 512>}, {pipeline_mode = #tpu.pipeline_mode<synchronous>, transform_indices = @transform_1, window_bounds = array<i64: 128, 512>}, {transform_indices = @transform_2, window_bounds = array<i64: 8, 8, 128>}]} {
    %c0_i32 = arith.constant 0 : i32
    %0 = arith.cmpi eq, %arg1, %c0_i32 : i32
    %1 = arith.extui %0 : i1 to i32
    %c0_i32_0 = arith.constant 0 : i32
    %2 = arith.cmpi ne, %1, %c0_i32_0 : i32
    scf.if %2 {
      %cst_186 = arith.constant 0.000000e+00 : f32
      %340 = vector.broadcast %cst_186 : f32 to vector<8x128xf32>
      %c0_187 = arith.constant 0 : index
      %c0_188 = arith.constant 0 : index
      %341 = vector.load %arg5[%c0_187, %c0_188] : memref<8x128xf32, #tpu.memory_space<vmem>>, vector<8x128xf32>
      tpu.vector_store %arg5[%c0_187, %c0_188], %340 {strides = array<i32>} : memref<8x128xf32, #tpu.memory_space<vmem>>, vector<8x128xf32>,
      %cst_189 = arith.constant 0.000000e+00 : f32
      %342 = vector.broadcast %cst_189 : f32 to vector<8x128xf32>
      %c0_190 = arith.constant 0 : index
      %c0_191 = arith.constant 0 : index
      %343 = vector.load %arg6[%c0_190, %c0_191] : memref<8x128xf32, #tpu.memory_space<vmem>>, vector<8x128xf32>
      tpu.vector_store %arg6[%c0_190, %c0_191], %342 {strides = array<i32>} : memref<8x128xf32, #tpu.memory_space<vmem>>, vector<8x128xf32>,
    } else {
    }
    %c0 = arith.constant 0 : index
    %c0_1 = arith.constant 0 : index
    %3 = vector.load %arg3[%c0, %c0_1] : memref<128x512xf32, #tpu.memory_space<vmem>>, vector<128x512xf32>
    %c0_2 = arith.constant 0 : index
    %c0_3 = arith.constant 0 : index
    %c0_4 = arith.constant 0 : index
    %4 = vector.load %arg2[%c0_2, %c0_3, %c0_4] : memref<8x8x512xf32, #tpu.memory_space<vmem>>, vector<1x8x512xf32>
    %5 = vector.shape_cast %4 : vector<1x8x512xf32> to vector<8x512xf32>
    %c0_5 = arith.constant 0 : index
    %c0_6 = arith.constant 0 : index
    %6 = vector.load %arg5[%c0_5, %c0_6] : memref<8x128xf32, #tpu.memory_space<vmem>>, vector<8x128xf32>
    %cst = arith.constant dense<0.000000e+00> : vector<8x512xf32>
    %7 = tpu.matmul %6, %3, %cst {dimension_numbers = #tpu.dot_dimension_numbers<[1], [0], [0], [1], [0, 0, 1, 1], [], []>} : vector<8x128xf32>, vector<128x512xf32>, vector<8x512xf32> -> vector<8x512xf32>
    %8 = arith.addf %5, %7 : vector<8x512xf32>
    %9 = vector.extract_strided_slice %8 {offsets = [0, 0], sizes = [8, 128], strides = [1, 1]} : vector<8x512xf32> to vector<8x128xf32>
    %cst_7 = arith.constant 5.000000e-01 : f32
    %10 = vector.broadcast %cst_7 : f32 to vector<8x128xf32>
    %11 = arith.mulf %10, %9 : vector<8x128xf32>
    %12 = math.tanh %11 : vector<8x128xf32>
    %cst_8 = arith.constant 5.000000e-01 : f32
    %13 = vector.broadcast %cst_8 : f32 to vector<8x128xf32>
    %14 = arith.mulf %13, %12 : vector<8x128xf32>
    %cst_9 = arith.constant 5.000000e-01 : f32
    %15 = vector.broadcast %cst_9 : f32 to vector<8x128xf32>
    %16 = arith.addf %14, %15 : vector<8x128xf32>
    %17 = vector.extract_strided_slice %8 {offsets = [0, 128], sizes = [8, 128], strides = [1, 1]} : vector<8x512xf32> to vector<8x128xf32>
    %cst_10 = arith.constant 5.000000e-01 : f32
    %18 = vector.broadcast %cst_10 : f32 to vector<8x128xf32>
    %19 = arith.mulf %18, %17 : vector<8x128xf32>
    %20 = math.tanh %19 : vector<8x128xf32>
    %cst_11 = arith.constant 5.000000e-01 : f32
    %21 = vector.broadcast %cst_11 : f32 to vector<8x128xf32>
    %22 = arith.mulf %21, %20 : vector<8x128xf32>
    %cst_12 = arith.constant 5.000000e-01 : f32
    %23 = vector.broadcast %cst_12 : f32 to vector<8x128xf32>
    %24 = arith.addf %22, %23 : vector<8x128xf32>
    %25 = vector.extract_strided_slice %8 {offsets = [0, 256], sizes = [8, 128], strides = [1, 1]} : vector<8x512xf32> to vector<8x128xf32>
    %26 = math.tanh %25 : vector<8x128xf32>
    %27 = vector.extract_strided_slice %8 {offsets = [0, 384], sizes = [8, 128], strides = [1, 1]} : vector<8x512xf32> to vector<8x128xf32>
    %cst_13 = arith.constant 5.000000e-01 : f32
    %28 = vector.broadcast %cst_13 : f32 to vector<8x128xf32>
    %29 = arith.mulf %28, %27 : vector<8x128xf32>
    %30 = math.tanh %29 : vector<8x128xf32>
    %cst_14 = arith.constant 5.000000e-01 : f32
    %31 = vector.broadcast %cst_14 : f32 to vector<8x128xf32>
    %32 = arith.mulf %31, %30 : vector<8x128xf32>
    %cst_15 = arith.constant 5.000000e-01 : f32
    %33 = vector.broadcast %cst_15 : f32 to vector<8x128xf32>
    %34 = arith.addf %32, %33 : vector<8x128xf32>
    %c0_16 = arith.constant 0 : index
    %c0_17 = arith.constant 0 : index
    %35 = vector.load %arg6[%c0_16, %c0_17] : memref<8x128xf32, #tpu.memory_space<vmem>>, vector<8x128xf32>
    %36 = arith.mulf %24, %35 : vector<8x128xf32>
    %37 = arith.mulf %16, %26 : vector<8x128xf32>
    %38 = arith.addf %36, %37 : vector<8x128xf32>
    %39 = math.tanh %38 : vector<8x128xf32>
    %40 = arith.mulf %34, %39 : vector<8x128xf32>
    %c0_18 = arith.constant 0 : index
    %c0_19 = arith.constant 0 : index
    %41 = vector.load %arg6[%c0_18, %c0_19] : memref<8x128xf32, #tpu.memory_space<vmem>>, vector<8x128xf32>
    tpu.vector_store %arg6[%c0_18, %c0_19], %38 {strides = array<i32>} : memref<8x128xf32, #tpu.memory_space<vmem>>, vector<8x128xf32>,
    %c0_20 = arith.constant 0 : index
    %c0_21 = arith.constant 0 : index
    %42 = vector.load %arg5[%c0_20, %c0_21] : memref<8x128xf32, #tpu.memory_space<vmem>>, vector<8x128xf32>
    tpu.vector_store %arg5[%c0_20, %c0_21], %40 {strides = array<i32>} : memref<8x128xf32, #tpu.memory_space<vmem>>, vector<8x128xf32>,
    %c0_22 = arith.constant 0 : index
    %c0_23 = arith.constant 0 : index
    %c0_24 = arith.constant 0 : index
    %43 = vector.load %arg4[%c0_22, %c0_23, %c0_24] : memref<8x8x128xf32, #tpu.memory_space<vmem>>, vector<1x8x128xf32>
    %44 = vector.shape_cast %43 : vector<1x8x128xf32> to vector<8x128xf32>
    %45 = vector.shape_cast %40 : vector<8x128xf32> to vector<1x8x128xf32>
    tpu.vector_store %arg4[%c0_22, %c0_23, %c0_24], %45 {strides = array<i32>} : memref<8x8x128xf32, #tpu.memory_space<vmem>>, vector<1x8x128xf32>,
    %c1 = arith.constant 1 : index
    %c0_25 = arith.constant 0 : index
    %c0_26 = arith.constant 0 : index
    %46 = vector.load %arg2[%c1, %c0_25, %c0_26] : memref<8x8x512xf32, #tpu.memory_space<vmem>>, vector<1x8x512xf32>
    %47 = vector.shape_cast %46 : vector<1x8x512xf32> to vector<8x512xf32>
    %c0_27 = arith.constant 0 : index
    %c0_28 = arith.constant 0 : index
    %48 = vector.load %arg5[%c0_27, %c0_28] : memref<8x128xf32, #tpu.memory_space<vmem>>, vector<8x128xf32>
    %cst_29 = arith.constant dense<0.000000e+00> : vector<8x512xf32>
    %49 = tpu.matmul %48, %3, %cst_29 {dimension_numbers = #tpu.dot_dimension_numbers<[1], [0], [0], [1], [0, 0, 1, 1], [], []>} : vector<8x128xf32>, vector<128x512xf32>, vector<8x512xf32> -> vector<8x512xf32>
    %50 = arith.addf %47, %49 : vector<8x512xf32>
    %51 = vector.extract_strided_slice %50 {offsets = [0, 0], sizes = [8, 128], strides = [1, 1]} : vector<8x512xf32> to vector<8x128xf32>
    %cst_30 = arith.constant 5.000000e-01 : f32
    %52 = vector.broadcast %cst_30 : f32 to vector<8x128xf32>
    %53 = arith.mulf %52, %51 : vector<8x128xf32>
    %54 = math.tanh %53 : vector<8x128xf32>
    %cst_31 = arith.constant 5.000000e-01 : f32
    %55 = vector.broadcast %cst_31 : f32 to vector<8x128xf32>
    %56 = arith.mulf %55, %54 : vector<8x128xf32>
    %cst_32 = arith.constant 5.000000e-01 : f32
    %57 = vector.broadcast %cst_32 : f32 to vector<8x128xf32>
    %58 = arith.addf %56, %57 : vector<8x128xf32>
    %59 = vector.extract_strided_slice %50 {offsets = [0, 128], sizes = [8, 128], strides = [1, 1]} : vector<8x512xf32> to vector<8x128xf32>
    %cst_33 = arith.constant 5.000000e-01 : f32
    %60 = vector.broadcast %cst_33 : f32 to vector<8x128xf32>
    %61 = arith.mulf %60, %59 : vector<8x128xf32>
    %62 = math.tanh %61 : vector<8x128xf32>
    %cst_34 = arith.constant 5.000000e-01 : f32
    %63 = vector.broadcast %cst_34 : f32 to vector<8x128xf32>
    %64 = arith.mulf %63, %62 : vector<8x128xf32>
    %cst_35 = arith.constant 5.000000e-01 : f32
    %65 = vector.broadcast %cst_35 : f32 to vector<8x128xf32>
    %66 = arith.addf %64, %65 : vector<8x128xf32>
    %67 = vector.extract_strided_slice %50 {offsets = [0, 256], sizes = [8, 128], strides = [1, 1]} : vector<8x512xf32> to vector<8x128xf32>
    %68 = math.tanh %67 : vector<8x128xf32>
    %69 = vector.extract_strided_slice %50 {offsets = [0, 384], sizes = [8, 128], strides = [1, 1]} : vector<8x512xf32> to vector<8x128xf32>
    %cst_36 = arith.constant 5.000000e-01 : f32
    %70 = vector.broadcast %cst_36 : f32 to vector<8x128xf32>
    %71 = arith.mulf %70, %69 : vector<8x128xf32>
    %72 = math.tanh %71 : vector<8x128xf32>
    %cst_37 = arith.constant 5.000000e-01 : f32
    %73 = vector.broadcast %cst_37 : f32 to vector<8x128xf32>
    %74 = arith.mulf %73, %72 : vector<8x128xf32>
    %cst_38 = arith.constant 5.000000e-01 : f32
    %75 = vector.broadcast %cst_38 : f32 to vector<8x128xf32>
    %76 = arith.addf %74, %75 : vector<8x128xf32>
    %c0_39 = arith.constant 0 : index
    %c0_40 = arith.constant 0 : index
    %77 = vector.load %arg6[%c0_39, %c0_40] : memref<8x128xf32, #tpu.memory_space<vmem>>, vector<8x128xf32>
    %78 = arith.mulf %66, %77 : vector<8x128xf32>
    %79 = arith.mulf %58, %68 : vector<8x128xf32>
    %80 = arith.addf %78, %79 : vector<8x128xf32>
    %81 = math.tanh %80 : vector<8x128xf32>
    %82 = arith.mulf %76, %81 : vector<8x128xf32>
    %c0_41 = arith.constant 0 : index
    %c0_42 = arith.constant 0 : index
    %83 = vector.load %arg6[%c0_41, %c0_42] : memref<8x128xf32, #tpu.memory_space<vmem>>, vector<8x128xf32>
    tpu.vector_store %arg6[%c0_41, %c0_42], %80 {strides = array<i32>} : memref<8x128xf32, #tpu.memory_space<vmem>>, vector<8x128xf32>,
    %c0_43 = arith.constant 0 : index
    %c0_44 = arith.constant 0 : index
    %84 = vector.load %arg5[%c0_43, %c0_44] : memref<8x128xf32, #tpu.memory_space<vmem>>, vector<8x128xf32>
    tpu.vector_store %arg5[%c0_43, %c0_44], %82 {strides = array<i32>} : memref<8x128xf32, #tpu.memory_space<vmem>>, vector<8x128xf32>,
    %c1_45 = arith.constant 1 : index
    %c0_46 = arith.constant 0 : index
    %c0_47 = arith.constant 0 : index
    %85 = vector.load %arg4[%c1_45, %c0_46, %c0_47] : memref<8x8x128xf32, #tpu.memory_space<vmem>>, vector<1x8x128xf32>
    %86 = vector.shape_cast %85 : vector<1x8x128xf32> to vector<8x128xf32>
    %87 = vector.shape_cast %82 : vector<8x128xf32> to vector<1x8x128xf32>
    tpu.vector_store %arg4[%c1_45, %c0_46, %c0_47], %87 {strides = array<i32>} : memref<8x8x128xf32, #tpu.memory_space<vmem>>, vector<1x8x128xf32>,
    %c2 = arith.constant 2 : index
    %c0_48 = arith.constant 0 : index
    %c0_49 = arith.constant 0 : index
    %88 = vector.load %arg2[%c2, %c0_48, %c0_49] : memref<8x8x512xf32, #tpu.memory_space<vmem>>, vector<1x8x512xf32>
    %89 = vector.shape_cast %88 : vector<1x8x512xf32> to vector<8x512xf32>
    %c0_50 = arith.constant 0 : index
    %c0_51 = arith.constant 0 : index
    %90 = vector.load %arg5[%c0_50, %c0_51] : memref<8x128xf32, #tpu.memory_space<vmem>>, vector<8x128xf32>
    %cst_52 = arith.constant dense<0.000000e+00> : vector<8x512xf32>
    %91 = tpu.matmul %90, %3, %cst_52 {dimension_numbers = #tpu.dot_dimension_numbers<[1], [0], [0], [1], [0, 0, 1, 1], [], []>} : vector<8x128xf32>, vector<128x512xf32>, vector<8x512xf32> -> vector<8x512xf32>
    %92 = arith.addf %89, %91 : vector<8x512xf32>
    %93 = vector.extract_strided_slice %92 {offsets = [0, 0], sizes = [8, 128], strides = [1, 1]} : vector<8x512xf32> to vector<8x128xf32>
    %cst_53 = arith.constant 5.000000e-01 : f32
    %94 = vector.broadcast %cst_53 : f32 to vector<8x128xf32>
    %95 = arith.mulf %94, %93 : vector<8x128xf32>
    %96 = math.tanh %95 : vector<8x128xf32>
    %cst_54 = arith.constant 5.000000e-01 : f32
    %97 = vector.broadcast %cst_54 : f32 to vector<8x128xf32>
    %98 = arith.mulf %97, %96 : vector<8x128xf32>
    %cst_55 = arith.constant 5.000000e-01 : f32
    %99 = vector.broadcast %cst_55 : f32 to vector<8x128xf32>
    %100 = arith.addf %98, %99 : vector<8x128xf32>
    %101 = vector.extract_strided_slice %92 {offsets = [0, 128], sizes = [8, 128], strides = [1, 1]} : vector<8x512xf32> to vector<8x128xf32>
    %cst_56 = arith.constant 5.000000e-01 : f32
    %102 = vector.broadcast %cst_56 : f32 to vector<8x128xf32>
    %103 = arith.mulf %102, %101 : vector<8x128xf32>
    %104 = math.tanh %103 : vector<8x128xf32>
    %cst_57 = arith.constant 5.000000e-01 : f32
    %105 = vector.broadcast %cst_57 : f32 to vector<8x128xf32>
    %106 = arith.mulf %105, %104 : vector<8x128xf32>
    %cst_58 = arith.constant 5.000000e-01 : f32
    %107 = vector.broadcast %cst_58 : f32 to vector<8x128xf32>
    %108 = arith.addf %106, %107 : vector<8x128xf32>
    %109 = vector.extract_strided_slice %92 {offsets = [0, 256], sizes = [8, 128], strides = [1, 1]} : vector<8x512xf32> to vector<8x128xf32>
    %110 = math.tanh %109 : vector<8x128xf32>
    %111 = vector.extract_strided_slice %92 {offsets = [0, 384], sizes = [8, 128], strides = [1, 1]} : vector<8x512xf32> to vector<8x128xf32>
    %cst_59 = arith.constant 5.000000e-01 : f32
    %112 = vector.broadcast %cst_59 : f32 to vector<8x128xf32>
    %113 = arith.mulf %112, %111 : vector<8x128xf32>
    %114 = math.tanh %113 : vector<8x128xf32>
    %cst_60 = arith.constant 5.000000e-01 : f32
    %115 = vector.broadcast %cst_60 : f32 to vector<8x128xf32>
    %116 = arith.mulf %115, %114 : vector<8x128xf32>
    %cst_61 = arith.constant 5.000000e-01 : f32
    %117 = vector.broadcast %cst_61 : f32 to vector<8x128xf32>
    %118 = arith.addf %116, %117 : vector<8x128xf32>
    %c0_62 = arith.constant 0 : index
    %c0_63 = arith.constant 0 : index
    %119 = vector.load %arg6[%c0_62, %c0_63] : memref<8x128xf32, #tpu.memory_space<vmem>>, vector<8x128xf32>
    %120 = arith.mulf %108, %119 : vector<8x128xf32>
    %121 = arith.mulf %100, %110 : vector<8x128xf32>
    %122 = arith.addf %120, %121 : vector<8x128xf32>
    %123 = math.tanh %122 : vector<8x128xf32>
    %124 = arith.mulf %118, %123 : vector<8x128xf32>
    %c0_64 = arith.constant 0 : index
    %c0_65 = arith.constant 0 : index
    %125 = vector.load %arg6[%c0_64, %c0_65] : memref<8x128xf32, #tpu.memory_space<vmem>>, vector<8x128xf32>
    tpu.vector_store %arg6[%c0_64, %c0_65], %122 {strides = array<i32>} : memref<8x128xf32, #tpu.memory_space<vmem>>, vector<8x128xf32>,
    %c0_66 = arith.constant 0 : index
    %c0_67 = arith.constant 0 : index
    %126 = vector.load %arg5[%c0_66, %c0_67] : memref<8x128xf32, #tpu.memory_space<vmem>>, vector<8x128xf32>
    tpu.vector_store %arg5[%c0_66, %c0_67], %124 {strides = array<i32>} : memref<8x128xf32, #tpu.memory_space<vmem>>, vector<8x128xf32>,
    %c2_68 = arith.constant 2 : index
    %c0_69 = arith.constant 0 : index
    %c0_70 = arith.constant 0 : index
    %127 = vector.load %arg4[%c2_68, %c0_69, %c0_70] : memref<8x8x128xf32, #tpu.memory_space<vmem>>, vector<1x8x128xf32>
    %128 = vector.shape_cast %127 : vector<1x8x128xf32> to vector<8x128xf32>
    %129 = vector.shape_cast %124 : vector<8x128xf32> to vector<1x8x128xf32>
    tpu.vector_store %arg4[%c2_68, %c0_69, %c0_70], %129 {strides = array<i32>} : memref<8x8x128xf32, #tpu.memory_space<vmem>>, vector<1x8x128xf32>,
    %c3 = arith.constant 3 : index
    %c0_71 = arith.constant 0 : index
    %c0_72 = arith.constant 0 : index
    %130 = vector.load %arg2[%c3, %c0_71, %c0_72] : memref<8x8x512xf32, #tpu.memory_space<vmem>>, vector<1x8x512xf32>
    %131 = vector.shape_cast %130 : vector<1x8x512xf32> to vector<8x512xf32>
    %c0_73 = arith.constant 0 : index
    %c0_74 = arith.constant 0 : index
    %132 = vector.load %arg5[%c0_73, %c0_74] : memref<8x128xf32, #tpu.memory_space<vmem>>, vector<8x128xf32>
    %cst_75 = arith.constant dense<0.000000e+00> : vector<8x512xf32>
    %133 = tpu.matmul %132, %3, %cst_75 {dimension_numbers = #tpu.dot_dimension_numbers<[1], [0], [0], [1], [0, 0, 1, 1], [], []>} : vector<8x128xf32>, vector<128x512xf32>, vector<8x512xf32> -> vector<8x512xf32>
    %134 = arith.addf %131, %133 : vector<8x512xf32>
    %135 = vector.extract_strided_slice %134 {offsets = [0, 0], sizes = [8, 128], strides = [1, 1]} : vector<8x512xf32> to vector<8x128xf32>
    %cst_76 = arith.constant 5.000000e-01 : f32
    %136 = vector.broadcast %cst_76 : f32 to vector<8x128xf32>
    %137 = arith.mulf %136, %135 : vector<8x128xf32>
    %138 = math.tanh %137 : vector<8x128xf32>
    %cst_77 = arith.constant 5.000000e-01 : f32
    %139 = vector.broadcast %cst_77 : f32 to vector<8x128xf32>
    %140 = arith.mulf %139, %138 : vector<8x128xf32>
    %cst_78 = arith.constant 5.000000e-01 : f32
    %141 = vector.broadcast %cst_78 : f32 to vector<8x128xf32>
    %142 = arith.addf %140, %141 : vector<8x128xf32>
    %143 = vector.extract_strided_slice %134 {offsets = [0, 128], sizes = [8, 128], strides = [1, 1]} : vector<8x512xf32> to vector<8x128xf32>
    %cst_79 = arith.constant 5.000000e-01 : f32
    %144 = vector.broadcast %cst_79 : f32 to vector<8x128xf32>
    %145 = arith.mulf %144, %143 : vector<8x128xf32>
    %146 = math.tanh %145 : vector<8x128xf32>
    %cst_80 = arith.constant 5.000000e-01 : f32
    %147 = vector.broadcast %cst_80 : f32 to vector<8x128xf32>
    %148 = arith.mulf %147, %146 : vector<8x128xf32>
    %cst_81 = arith.constant 5.000000e-01 : f32
    %149 = vector.broadcast %cst_81 : f32 to vector<8x128xf32>
    %150 = arith.addf %148, %149 : vector<8x128xf32>
    %151 = vector.extract_strided_slice %134 {offsets = [0, 256], sizes = [8, 128], strides = [1, 1]} : vector<8x512xf32> to vector<8x128xf32>
    %152 = math.tanh %151 : vector<8x128xf32>
    %153 = vector.extract_strided_slice %134 {offsets = [0, 384], sizes = [8, 128], strides = [1, 1]} : vector<8x512xf32> to vector<8x128xf32>
    %cst_82 = arith.constant 5.000000e-01 : f32
    %154 = vector.broadcast %cst_82 : f32 to vector<8x128xf32>
    %155 = arith.mulf %154, %153 : vector<8x128xf32>
    %156 = math.tanh %155 : vector<8x128xf32>
    %cst_83 = arith.constant 5.000000e-01 : f32
    %157 = vector.broadcast %cst_83 : f32 to vector<8x128xf32>
    %158 = arith.mulf %157, %156 : vector<8x128xf32>
    %cst_84 = arith.constant 5.000000e-01 : f32
    %159 = vector.broadcast %cst_84 : f32 to vector<8x128xf32>
    %160 = arith.addf %158, %159 : vector<8x128xf32>
    %c0_85 = arith.constant 0 : index
    %c0_86 = arith.constant 0 : index
    %161 = vector.load %arg6[%c0_85, %c0_86] : memref<8x128xf32, #tpu.memory_space<vmem>>, vector<8x128xf32>
    %162 = arith.mulf %150, %161 : vector<8x128xf32>
    %163 = arith.mulf %142, %152 : vector<8x128xf32>
    %164 = arith.addf %162, %163 : vector<8x128xf32>
    %165 = math.tanh %164 : vector<8x128xf32>
    %166 = arith.mulf %160, %165 : vector<8x128xf32>
    %c0_87 = arith.constant 0 : index
    %c0_88 = arith.constant 0 : index
    %167 = vector.load %arg6[%c0_87, %c0_88] : memref<8x128xf32, #tpu.memory_space<vmem>>, vector<8x128xf32>
    tpu.vector_store %arg6[%c0_87, %c0_88], %164 {strides = array<i32>} : memref<8x128xf32, #tpu.memory_space<vmem>>, vector<8x128xf32>,
    %c0_89 = arith.constant 0 : index
    %c0_90 = arith.constant 0 : index
    %168 = vector.load %arg5[%c0_89, %c0_90] : memref<8x128xf32, #tpu.memory_space<vmem>>, vector<8x128xf32>
    tpu.vector_store %arg5[%c0_89, %c0_90], %166 {strides = array<i32>} : memref<8x128xf32, #tpu.memory_space<vmem>>, vector<8x128xf32>,
    %c3_91 = arith.constant 3 : index
    %c0_92 = arith.constant 0 : index
    %c0_93 = arith.constant 0 : index
    %169 = vector.load %arg4[%c3_91, %c0_92, %c0_93] : memref<8x8x128xf32, #tpu.memory_space<vmem>>, vector<1x8x128xf32>
    %170 = vector.shape_cast %169 : vector<1x8x128xf32> to vector<8x128xf32>
    %171 = vector.shape_cast %166 : vector<8x128xf32> to vector<1x8x128xf32>
    tpu.vector_store %arg4[%c3_91, %c0_92, %c0_93], %171 {strides = array<i32>} : memref<8x8x128xf32, #tpu.memory_space<vmem>>, vector<1x8x128xf32>,
    %c4 = arith.constant 4 : index
    %c0_94 = arith.constant 0 : index
    %c0_95 = arith.constant 0 : index
    %172 = vector.load %arg2[%c4, %c0_94, %c0_95] : memref<8x8x512xf32, #tpu.memory_space<vmem>>, vector<1x8x512xf32>
    %173 = vector.shape_cast %172 : vector<1x8x512xf32> to vector<8x512xf32>
    %c0_96 = arith.constant 0 : index
    %c0_97 = arith.constant 0 : index
    %174 = vector.load %arg5[%c0_96, %c0_97] : memref<8x128xf32, #tpu.memory_space<vmem>>, vector<8x128xf32>
    %cst_98 = arith.constant dense<0.000000e+00> : vector<8x512xf32>
    %175 = tpu.matmul %174, %3, %cst_98 {dimension_numbers = #tpu.dot_dimension_numbers<[1], [0], [0], [1], [0, 0, 1, 1], [], []>} : vector<8x128xf32>, vector<128x512xf32>, vector<8x512xf32> -> vector<8x512xf32>
    %176 = arith.addf %173, %175 : vector<8x512xf32>
    %177 = vector.extract_strided_slice %176 {offsets = [0, 0], sizes = [8, 128], strides = [1, 1]} : vector<8x512xf32> to vector<8x128xf32>
    %cst_99 = arith.constant 5.000000e-01 : f32
    %178 = vector.broadcast %cst_99 : f32 to vector<8x128xf32>
    %179 = arith.mulf %178, %177 : vector<8x128xf32>
    %180 = math.tanh %179 : vector<8x128xf32>
    %cst_100 = arith.constant 5.000000e-01 : f32
    %181 = vector.broadcast %cst_100 : f32 to vector<8x128xf32>
    %182 = arith.mulf %181, %180 : vector<8x128xf32>
    %cst_101 = arith.constant 5.000000e-01 : f32
    %183 = vector.broadcast %cst_101 : f32 to vector<8x128xf32>
    %184 = arith.addf %182, %183 : vector<8x128xf32>
    %185 = vector.extract_strided_slice %176 {offsets = [0, 128], sizes = [8, 128], strides = [1, 1]} : vector<8x512xf32> to vector<8x128xf32>
    %cst_102 = arith.constant 5.000000e-01 : f32
    %186 = vector.broadcast %cst_102 : f32 to vector<8x128xf32>
    %187 = arith.mulf %186, %185 : vector<8x128xf32>
    %188 = math.tanh %187 : vector<8x128xf32>
    %cst_103 = arith.constant 5.000000e-01 : f32
    %189 = vector.broadcast %cst_103 : f32 to vector<8x128xf32>
    %190 = arith.mulf %189, %188 : vector<8x128xf32>
    %cst_104 = arith.constant 5.000000e-01 : f32
    %191 = vector.broadcast %cst_104 : f32 to vector<8x128xf32>
    %192 = arith.addf %190, %191 : vector<8x128xf32>
    %193 = vector.extract_strided_slice %176 {offsets = [0, 256], sizes = [8, 128], strides = [1, 1]} : vector<8x512xf32> to vector<8x128xf32>
    %194 = math.tanh %193 : vector<8x128xf32>
    %195 = vector.extract_strided_slice %176 {offsets = [0, 384], sizes = [8, 128], strides = [1, 1]} : vector<8x512xf32> to vector<8x128xf32>
    %cst_105 = arith.constant 5.000000e-01 : f32
    %196 = vector.broadcast %cst_105 : f32 to vector<8x128xf32>
    %197 = arith.mulf %196, %195 : vector<8x128xf32>
    %198 = math.tanh %197 : vector<8x128xf32>
    %cst_106 = arith.constant 5.000000e-01 : f32
    %199 = vector.broadcast %cst_106 : f32 to vector<8x128xf32>
    %200 = arith.mulf %199, %198 : vector<8x128xf32>
    %cst_107 = arith.constant 5.000000e-01 : f32
    %201 = vector.broadcast %cst_107 : f32 to vector<8x128xf32>
    %202 = arith.addf %200, %201 : vector<8x128xf32>
    %c0_108 = arith.constant 0 : index
    %c0_109 = arith.constant 0 : index
    %203 = vector.load %arg6[%c0_108, %c0_109] : memref<8x128xf32, #tpu.memory_space<vmem>>, vector<8x128xf32>
    %204 = arith.mulf %192, %203 : vector<8x128xf32>
    %205 = arith.mulf %184, %194 : vector<8x128xf32>
    %206 = arith.addf %204, %205 : vector<8x128xf32>
    %207 = math.tanh %206 : vector<8x128xf32>
    %208 = arith.mulf %202, %207 : vector<8x128xf32>
    %c0_110 = arith.constant 0 : index
    %c0_111 = arith.constant 0 : index
    %209 = vector.load %arg6[%c0_110, %c0_111] : memref<8x128xf32, #tpu.memory_space<vmem>>, vector<8x128xf32>
    tpu.vector_store %arg6[%c0_110, %c0_111], %206 {strides = array<i32>} : memref<8x128xf32, #tpu.memory_space<vmem>>, vector<8x128xf32>,
    %c0_112 = arith.constant 0 : index
    %c0_113 = arith.constant 0 : index
    %210 = vector.load %arg5[%c0_112, %c0_113] : memref<8x128xf32, #tpu.memory_space<vmem>>, vector<8x128xf32>
    tpu.vector_store %arg5[%c0_112, %c0_113], %208 {strides = array<i32>} : memref<8x128xf32, #tpu.memory_space<vmem>>, vector<8x128xf32>,
    %c4_114 = arith.constant 4 : index
    %c0_115 = arith.constant 0 : index
    %c0_116 = arith.constant 0 : index
    %211 = vector.load %arg4[%c4_114, %c0_115, %c0_116] : memref<8x8x128xf32, #tpu.memory_space<vmem>>, vector<1x8x128xf32>
    %212 = vector.shape_cast %211 : vector<1x8x128xf32> to vector<8x128xf32>
    %213 = vector.shape_cast %208 : vector<8x128xf32> to vector<1x8x128xf32>
    tpu.vector_store %arg4[%c4_114, %c0_115, %c0_116], %213 {strides = array<i32>} : memref<8x8x128xf32, #tpu.memory_space<vmem>>, vector<1x8x128xf32>,
    %c5 = arith.constant 5 : index
    %c0_117 = arith.constant 0 : index
    %c0_118 = arith.constant 0 : index
    %214 = vector.load %arg2[%c5, %c0_117, %c0_118] : memref<8x8x512xf32, #tpu.memory_space<vmem>>, vector<1x8x512xf32>
    %215 = vector.shape_cast %214 : vector<1x8x512xf32> to vector<8x512xf32>
    %c0_119 = arith.constant 0 : index
    %c0_120 = arith.constant 0 : index
    %216 = vector.load %arg5[%c0_119, %c0_120] : memref<8x128xf32, #tpu.memory_space<vmem>>, vector<8x128xf32>
    %cst_121 = arith.constant dense<0.000000e+00> : vector<8x512xf32>
    %217 = tpu.matmul %216, %3, %cst_121 {dimension_numbers = #tpu.dot_dimension_numbers<[1], [0], [0], [1], [0, 0, 1, 1], [], []>} : vector<8x128xf32>, vector<128x512xf32>, vector<8x512xf32> -> vector<8x512xf32>
    %218 = arith.addf %215, %217 : vector<8x512xf32>
    %219 = vector.extract_strided_slice %218 {offsets = [0, 0], sizes = [8, 128], strides = [1, 1]} : vector<8x512xf32> to vector<8x128xf32>
    %cst_122 = arith.constant 5.000000e-01 : f32
    %220 = vector.broadcast %cst_122 : f32 to vector<8x128xf32>
    %221 = arith.mulf %220, %219 : vector<8x128xf32>
    %222 = math.tanh %221 : vector<8x128xf32>
    %cst_123 = arith.constant 5.000000e-01 : f32
    %223 = vector.broadcast %cst_123 : f32 to vector<8x128xf32>
    %224 = arith.mulf %223, %222 : vector<8x128xf32>
    %cst_124 = arith.constant 5.000000e-01 : f32
    %225 = vector.broadcast %cst_124 : f32 to vector<8x128xf32>
    %226 = arith.addf %224, %225 : vector<8x128xf32>
    %227 = vector.extract_strided_slice %218 {offsets = [0, 128], sizes = [8, 128], strides = [1, 1]} : vector<8x512xf32> to vector<8x128xf32>
    %cst_125 = arith.constant 5.000000e-01 : f32
    %228 = vector.broadcast %cst_125 : f32 to vector<8x128xf32>
    %229 = arith.mulf %228, %227 : vector<8x128xf32>
    %230 = math.tanh %229 : vector<8x128xf32>
    %cst_126 = arith.constant 5.000000e-01 : f32
    %231 = vector.broadcast %cst_126 : f32 to vector<8x128xf32>
    %232 = arith.mulf %231, %230 : vector<8x128xf32>
    %cst_127 = arith.constant 5.000000e-01 : f32
    %233 = vector.broadcast %cst_127 : f32 to vector<8x128xf32>
    %234 = arith.addf %232, %233 : vector<8x128xf32>
    %235 = vector.extract_strided_slice %218 {offsets = [0, 256], sizes = [8, 128], strides = [1, 1]} : vector<8x512xf32> to vector<8x128xf32>
    %236 = math.tanh %235 : vector<8x128xf32>
    %237 = vector.extract_strided_slice %218 {offsets = [0, 384], sizes = [8, 128], strides = [1, 1]} : vector<8x512xf32> to vector<8x128xf32>
    %cst_128 = arith.constant 5.000000e-01 : f32
    %238 = vector.broadcast %cst_128 : f32 to vector<8x128xf32>
    %239 = arith.mulf %238, %237 : vector<8x128xf32>
    %240 = math.tanh %239 : vector<8x128xf32>
    %cst_129 = arith.constant 5.000000e-01 : f32
    %241 = vector.broadcast %cst_129 : f32 to vector<8x128xf32>
    %242 = arith.mulf %241, %240 : vector<8x128xf32>
    %cst_130 = arith.constant 5.000000e-01 : f32
    %243 = vector.broadcast %cst_130 : f32 to vector<8x128xf32>
    %244 = arith.addf %242, %243 : vector<8x128xf32>
    %c0_131 = arith.constant 0 : index
    %c0_132 = arith.constant 0 : index
    %245 = vector.load %arg6[%c0_131, %c0_132] : memref<8x128xf32, #tpu.memory_space<vmem>>, vector<8x128xf32>
    %246 = arith.mulf %234, %245 : vector<8x128xf32>
    %247 = arith.mulf %226, %236 : vector<8x128xf32>
    %248 = arith.addf %246, %247 : vector<8x128xf32>
    %249 = math.tanh %248 : vector<8x128xf32>
    %250 = arith.mulf %244, %249 : vector<8x128xf32>
    %c0_133 = arith.constant 0 : index
    %c0_134 = arith.constant 0 : index
    %251 = vector.load %arg6[%c0_133, %c0_134] : memref<8x128xf32, #tpu.memory_space<vmem>>, vector<8x128xf32>
    tpu.vector_store %arg6[%c0_133, %c0_134], %248 {strides = array<i32>} : memref<8x128xf32, #tpu.memory_space<vmem>>, vector<8x128xf32>,
    %c0_135 = arith.constant 0 : index
    %c0_136 = arith.constant 0 : index
    %252 = vector.load %arg5[%c0_135, %c0_136] : memref<8x128xf32, #tpu.memory_space<vmem>>, vector<8x128xf32>
    tpu.vector_store %arg5[%c0_135, %c0_136], %250 {strides = array<i32>} : memref<8x128xf32, #tpu.memory_space<vmem>>, vector<8x128xf32>,
    %c5_137 = arith.constant 5 : index
    %c0_138 = arith.constant 0 : index
    %c0_139 = arith.constant 0 : index
    %253 = vector.load %arg4[%c5_137, %c0_138, %c0_139] : memref<8x8x128xf32, #tpu.memory_space<vmem>>, vector<1x8x128xf32>
    %254 = vector.shape_cast %253 : vector<1x8x128xf32> to vector<8x128xf32>
    %255 = vector.shape_cast %250 : vector<8x128xf32> to vector<1x8x128xf32>
    tpu.vector_store %arg4[%c5_137, %c0_138, %c0_139], %255 {strides = array<i32>} : memref<8x8x128xf32, #tpu.memory_space<vmem>>, vector<1x8x128xf32>,
    %c6 = arith.constant 6 : index
    %c0_140 = arith.constant 0 : index
    %c0_141 = arith.constant 0 : index
    %256 = vector.load %arg2[%c6, %c0_140, %c0_141] : memref<8x8x512xf32, #tpu.memory_space<vmem>>, vector<1x8x512xf32>
    %257 = vector.shape_cast %256 : vector<1x8x512xf32> to vector<8x512xf32>
    %c0_142 = arith.constant 0 : index
    %c0_143 = arith.constant 0 : index
    %258 = vector.load %arg5[%c0_142, %c0_143] : memref<8x128xf32, #tpu.memory_space<vmem>>, vector<8x128xf32>
    %cst_144 = arith.constant dense<0.000000e+00> : vector<8x512xf32>
    %259 = tpu.matmul %258, %3, %cst_144 {dimension_numbers = #tpu.dot_dimension_numbers<[1], [0], [0], [1], [0, 0, 1, 1], [], []>} : vector<8x128xf32>, vector<128x512xf32>, vector<8x512xf32> -> vector<8x512xf32>
    %260 = arith.addf %257, %259 : vector<8x512xf32>
    %261 = vector.extract_strided_slice %260 {offsets = [0, 0], sizes = [8, 128], strides = [1, 1]} : vector<8x512xf32> to vector<8x128xf32>
    %cst_145 = arith.constant 5.000000e-01 : f32
    %262 = vector.broadcast %cst_145 : f32 to vector<8x128xf32>
    %263 = arith.mulf %262, %261 : vector<8x128xf32>
    %264 = math.tanh %263 : vector<8x128xf32>
    %cst_146 = arith.constant 5.000000e-01 : f32
    %265 = vector.broadcast %cst_146 : f32 to vector<8x128xf32>
    %266 = arith.mulf %265, %264 : vector<8x128xf32>
    %cst_147 = arith.constant 5.000000e-01 : f32
    %267 = vector.broadcast %cst_147 : f32 to vector<8x128xf32>
    %268 = arith.addf %266, %267 : vector<8x128xf32>
    %269 = vector.extract_strided_slice %260 {offsets = [0, 128], sizes = [8, 128], strides = [1, 1]} : vector<8x512xf32> to vector<8x128xf32>
    %cst_148 = arith.constant 5.000000e-01 : f32
    %270 = vector.broadcast %cst_148 : f32 to vector<8x128xf32>
    %271 = arith.mulf %270, %269 : vector<8x128xf32>
    %272 = math.tanh %271 : vector<8x128xf32>
    %cst_149 = arith.constant 5.000000e-01 : f32
    %273 = vector.broadcast %cst_149 : f32 to vector<8x128xf32>
    %274 = arith.mulf %273, %272 : vector<8x128xf32>
    %cst_150 = arith.constant 5.000000e-01 : f32
    %275 = vector.broadcast %cst_150 : f32 to vector<8x128xf32>
    %276 = arith.addf %274, %275 : vector<8x128xf32>
    %277 = vector.extract_strided_slice %260 {offsets = [0, 256], sizes = [8, 128], strides = [1, 1]} : vector<8x512xf32> to vector<8x128xf32>
    %278 = math.tanh %277 : vector<8x128xf32>
    %279 = vector.extract_strided_slice %260 {offsets = [0, 384], sizes = [8, 128], strides = [1, 1]} : vector<8x512xf32> to vector<8x128xf32>
    %cst_151 = arith.constant 5.000000e-01 : f32
    %280 = vector.broadcast %cst_151 : f32 to vector<8x128xf32>
    %281 = arith.mulf %280, %279 : vector<8x128xf32>
    %282 = math.tanh %281 : vector<8x128xf32>
    %cst_152 = arith.constant 5.000000e-01 : f32
    %283 = vector.broadcast %cst_152 : f32 to vector<8x128xf32>
    %284 = arith.mulf %283, %282 : vector<8x128xf32>
    %cst_153 = arith.constant 5.000000e-01 : f32
    %285 = vector.broadcast %cst_153 : f32 to vector<8x128xf32>
    %286 = arith.addf %284, %285 : vector<8x128xf32>
    %c0_154 = arith.constant 0 : index
    %c0_155 = arith.constant 0 : index
    %287 = vector.load %arg6[%c0_154, %c0_155] : memref<8x128xf32, #tpu.memory_space<vmem>>, vector<8x128xf32>
    %288 = arith.mulf %276, %287 : vector<8x128xf32>
    %289 = arith.mulf %268, %278 : vector<8x128xf32>
    %290 = arith.addf %288, %289 : vector<8x128xf32>
    %291 = math.tanh %290 : vector<8x128xf32>
    %292 = arith.mulf %286, %291 : vector<8x128xf32>
    %c0_156 = arith.constant 0 : index
    %c0_157 = arith.constant 0 : index
    %293 = vector.load %arg6[%c0_156, %c0_157] : memref<8x128xf32, #tpu.memory_space<vmem>>, vector<8x128xf32>
    tpu.vector_store %arg6[%c0_156, %c0_157], %290 {strides = array<i32>} : memref<8x128xf32, #tpu.memory_space<vmem>>, vector<8x128xf32>,
    %c0_158 = arith.constant 0 : index
    %c0_159 = arith.constant 0 : index
    %294 = vector.load %arg5[%c0_158, %c0_159] : memref<8x128xf32, #tpu.memory_space<vmem>>, vector<8x128xf32>
    tpu.vector_store %arg5[%c0_158, %c0_159], %292 {strides = array<i32>} : memref<8x128xf32, #tpu.memory_space<vmem>>, vector<8x128xf32>,
    %c6_160 = arith.constant 6 : index
    %c0_161 = arith.constant 0 : index
    %c0_162 = arith.constant 0 : index
    %295 = vector.load %arg4[%c6_160, %c0_161, %c0_162] : memref<8x8x128xf32, #tpu.memory_space<vmem>>, vector<1x8x128xf32>
    %296 = vector.shape_cast %295 : vector<1x8x128xf32> to vector<8x128xf32>
    %297 = vector.shape_cast %292 : vector<8x128xf32> to vector<1x8x128xf32>
    tpu.vector_store %arg4[%c6_160, %c0_161, %c0_162], %297 {strides = array<i32>} : memref<8x8x128xf32, #tpu.memory_space<vmem>>, vector<1x8x128xf32>,
    %c7 = arith.constant 7 : index
    %c0_163 = arith.constant 0 : index
    %c0_164 = arith.constant 0 : index
    %298 = vector.load %arg2[%c7, %c0_163, %c0_164] : memref<8x8x512xf32, #tpu.memory_space<vmem>>, vector<1x8x512xf32>
    %299 = vector.shape_cast %298 : vector<1x8x512xf32> to vector<8x512xf32>
    %c0_165 = arith.constant 0 : index
    %c0_166 = arith.constant 0 : index
    %300 = vector.load %arg5[%c0_165, %c0_166] : memref<8x128xf32, #tpu.memory_space<vmem>>, vector<8x128xf32>
    %cst_167 = arith.constant dense<0.000000e+00> : vector<8x512xf32>
    %301 = tpu.matmul %300, %3, %cst_167 {dimension_numbers = #tpu.dot_dimension_numbers<[1], [0], [0], [1], [0, 0, 1, 1], [], []>} : vector<8x128xf32>, vector<128x512xf32>, vector<8x512xf32> -> vector<8x512xf32>
    %302 = arith.addf %299, %301 : vector<8x512xf32>
    %303 = vector.extract_strided_slice %302 {offsets = [0, 0], sizes = [8, 128], strides = [1, 1]} : vector<8x512xf32> to vector<8x128xf32>
    %cst_168 = arith.constant 5.000000e-01 : f32
    %304 = vector.broadcast %cst_168 : f32 to vector<8x128xf32>
    %305 = arith.mulf %304, %303 : vector<8x128xf32>
    %306 = math.tanh %305 : vector<8x128xf32>
    %cst_169 = arith.constant 5.000000e-01 : f32
    %307 = vector.broadcast %cst_169 : f32 to vector<8x128xf32>
    %308 = arith.mulf %307, %306 : vector<8x128xf32>
    %cst_170 = arith.constant 5.000000e-01 : f32
    %309 = vector.broadcast %cst_170 : f32 to vector<8x128xf32>
    %310 = arith.addf %308, %309 : vector<8x128xf32>
    %311 = vector.extract_strided_slice %302 {offsets = [0, 128], sizes = [8, 128], strides = [1, 1]} : vector<8x512xf32> to vector<8x128xf32>
    %cst_171 = arith.constant 5.000000e-01 : f32
    %312 = vector.broadcast %cst_171 : f32 to vector<8x128xf32>
    %313 = arith.mulf %312, %311 : vector<8x128xf32>
    %314 = math.tanh %313 : vector<8x128xf32>
    %cst_172 = arith.constant 5.000000e-01 : f32
    %315 = vector.broadcast %cst_172 : f32 to vector<8x128xf32>
    %316 = arith.mulf %315, %314 : vector<8x128xf32>
    %cst_173 = arith.constant 5.000000e-01 : f32
    %317 = vector.broadcast %cst_173 : f32 to vector<8x128xf32>
    %318 = arith.addf %316, %317 : vector<8x128xf32>
    %319 = vector.extract_strided_slice %302 {offsets = [0, 256], sizes = [8, 128], strides = [1, 1]} : vector<8x512xf32> to vector<8x128xf32>
    %320 = math.tanh %319 : vector<8x128xf32>
    %321 = vector.extract_strided_slice %302 {offsets = [0, 384], sizes = [8, 128], strides = [1, 1]} : vector<8x512xf32> to vector<8x128xf32>
    %cst_174 = arith.constant 5.000000e-01 : f32
    %322 = vector.broadcast %cst_174 : f32 to vector<8x128xf32>
    %323 = arith.mulf %322, %321 : vector<8x128xf32>
    %324 = math.tanh %323 : vector<8x128xf32>
    %cst_175 = arith.constant 5.000000e-01 : f32
    %325 = vector.broadcast %cst_175 : f32 to vector<8x128xf32>
    %326 = arith.mulf %325, %324 : vector<8x128xf32>
    %cst_176 = arith.constant 5.000000e-01 : f32
    %327 = vector.broadcast %cst_176 : f32 to vector<8x128xf32>
    %328 = arith.addf %326, %327 : vector<8x128xf32>
    %c0_177 = arith.constant 0 : index
    %c0_178 = arith.constant 0 : index
    %329 = vector.load %arg6[%c0_177, %c0_178] : memref<8x128xf32, #tpu.memory_space<vmem>>, vector<8x128xf32>
    %330 = arith.mulf %318, %329 : vector<8x128xf32>
    %331 = arith.mulf %310, %320 : vector<8x128xf32>
    %332 = arith.addf %330, %331 : vector<8x128xf32>
    %333 = math.tanh %332 : vector<8x128xf32>
    %334 = arith.mulf %328, %333 : vector<8x128xf32>
    %c0_179 = arith.constant 0 : index
    %c0_180 = arith.constant 0 : index
    %335 = vector.load %arg6[%c0_179, %c0_180] : memref<8x128xf32, #tpu.memory_space<vmem>>, vector<8x128xf32>
    tpu.vector_store %arg6[%c0_179, %c0_180], %332 {strides = array<i32>} : memref<8x128xf32, #tpu.memory_space<vmem>>, vector<8x128xf32>,
    %c0_181 = arith.constant 0 : index
    %c0_182 = arith.constant 0 : index
    %336 = vector.load %arg5[%c0_181, %c0_182] : memref<8x128xf32, #tpu.memory_space<vmem>>, vector<8x128xf32>
    tpu.vector_store %arg5[%c0_181, %c0_182], %334 {strides = array<i32>} : memref<8x128xf32, #tpu.memory_space<vmem>>, vector<8x128xf32>,
    %c7_183 = arith.constant 7 : index
    %c0_184 = arith.constant 0 : index
    %c0_185 = arith.constant 0 : index
    %337 = vector.load %arg4[%c7_183, %c0_184, %c0_185] : memref<8x8x128xf32, #tpu.memory_space<vmem>>, vector<1x8x128xf32>
    %338 = vector.shape_cast %337 : vector<1x8x128xf32> to vector<8x128xf32>
    %339 = vector.shape_cast %334 : vector<8x128xf32> to vector<1x8x128xf32>
    tpu.vector_store %arg4[%c7_183, %c0_184, %c0_185], %339 {strides = array<i32>} : memref<8x8x128xf32, #tpu.memory_space<vmem>>, vector<1x8x128xf32>,
    return
  }
  func.func @transform_0(%arg0: i32, %arg1: i32) -> (i32, i32, i32) {
    %c0_i32 = arith.constant 0 : i32
    %c0_i32_0 = arith.constant 0 : i32
    return %arg1, %arg0, %c0_i32 : i32, i32, i32
  }
  func.func @transform_1(%arg0: i32, %arg1: i32) -> (i32, i32) {
    %c0_i32 = arith.constant 0 : i32
    %c0_i32_0 = arith.constant 0 : i32
    %c0_i32_1 = arith.constant 0 : i32
    return %c0_i32, %c0_i32_0 : i32, i32
  }
  func.func @transform_2(%arg0: i32, %arg1: i32) -> (i32, i32, i32) {
    %c0_i32 = arith.constant 0 : i32
    %c0_i32_0 = arith.constant 0 : i32
    return %arg1, %arg0, %c0_i32 : i32, i32, i32
  }
}

module attributes {stable_mosaic.version = 11 : i64} {
  func.func @matmul_bias_kernel(%arg0: i32, %arg1: i32, %arg2: i32, %arg3: memref<64x128xf32, #tpu.memory_space<vmem>>, %arg4: memref<128x512xf32, #tpu.memory_space<vmem>>, %arg5: memref<1x512xf32, #tpu.memory_space<vmem>>, %arg6: memref<64x512xf32, #tpu.memory_space<vmem>>, %arg7: memref<64x512xf32, #tpu.memory_space<vmem>>) attributes {dimension_semantics = [#tpu.dimension_semantics<parallel>, #tpu.dimension_semantics<parallel>, #tpu.dimension_semantics<arbitrary>], iteration_bounds = array<i64: 1, 1, 1>, scalar_prefetch = 0 : i64, scratch_operands = 1 : i64, tpu.core_type = #tpu.core_type<tc>, window_params = [{transform_indices = @transform_0, window_bounds = array<i64: 64, 128>}, {transform_indices = @transform_1, window_bounds = array<i64: 128, 512>}, {transform_indices = @transform_2, window_bounds = array<i64: 1, 512>}, {transform_indices = @transform_3, window_bounds = array<i64: 64, 512>}]} {
    %c0_i32 = arith.constant 0 : i32
    %0 = arith.cmpi eq, %arg2, %c0_i32 : i32
    %1 = arith.extui %0 : i1 to i32
    %c0_i32_0 = arith.constant 0 : i32
    %2 = arith.cmpi ne, %1, %c0_i32_0 : i32
    scf.if %2 {
      %cst_10 = arith.constant 0.000000e+00 : f32
      %12 = vector.broadcast %cst_10 : f32 to vector<64x512xf32>
      %c0_11 = arith.constant 0 : index
      %c0_12 = arith.constant 0 : index
      %13 = vector.load %arg7[%c0_11, %c0_12] : memref<64x512xf32, #tpu.memory_space<vmem>>, vector<64x512xf32>
      tpu.vector_store %arg7[%c0_11, %c0_12], %12 {strides = array<i32>} : memref<64x512xf32, #tpu.memory_space<vmem>>, vector<64x512xf32>,
    } else {
    }
    %c0 = arith.constant 0 : index
    %c0_1 = arith.constant 0 : index
    %3 = vector.load %arg7[%c0, %c0_1] : memref<64x512xf32, #tpu.memory_space<vmem>>, vector<64x512xf32>
    %c0_2 = arith.constant 0 : index
    %c0_3 = arith.constant 0 : index
    %4 = vector.load %arg3[%c0_2, %c0_3] : memref<64x128xf32, #tpu.memory_space<vmem>>, vector<64x128xf32>
    %c0_4 = arith.constant 0 : index
    %c0_5 = arith.constant 0 : index
    %5 = vector.load %arg4[%c0_4, %c0_5] : memref<128x512xf32, #tpu.memory_space<vmem>>, vector<128x512xf32>
    %cst = arith.constant dense<0.000000e+00> : vector<64x512xf32>
    %6 = tpu.matmul %4, %5, %cst {dimension_numbers = #tpu.dot_dimension_numbers<[1], [0], [0], [1], [0, 0, 1, 1], [], []>} : vector<64x128xf32>, vector<128x512xf32>, vector<64x512xf32> -> vector<64x512xf32>
    %7 = arith.addf %3, %6 : vector<64x512xf32>
    %c0_6 = arith.constant 0 : index
    %c0_7 = arith.constant 0 : index
    %8 = vector.load %arg7[%c0_6, %c0_7] : memref<64x512xf32, #tpu.memory_space<vmem>>, vector<64x512xf32>
    tpu.vector_store %arg7[%c0_6, %c0_7], %7 {strides = array<i32>} : memref<64x512xf32, #tpu.memory_space<vmem>>, vector<64x512xf32>,
    %c0_i32_8 = arith.constant 0 : i32
    %9 = arith.cmpi eq, %arg2, %c0_i32_8 : i32
    %10 = arith.extui %9 : i1 to i32
    %c0_i32_9 = arith.constant 0 : i32
    %11 = arith.cmpi ne, %10, %c0_i32_9 : i32
    scf.if %11 {
      %c0_10 = arith.constant 0 : index
      %c0_11 = arith.constant 0 : index
      %12 = vector.load %arg7[%c0_10, %c0_11] : memref<64x512xf32, #tpu.memory_space<vmem>>, vector<64x512xf32>
      %c0_12 = arith.constant 0 : index
      %c0_13 = arith.constant 0 : index
      %13 = vector.load %arg5[%c0_12, %c0_13] : memref<1x512xf32, #tpu.memory_space<vmem>>, vector<1x512xf32>
      %14 = vector.broadcast %13 : vector<1x512xf32> to vector<64x512xf32>
      %15 = arith.addf %12, %14 : vector<64x512xf32>
      %c0_14 = arith.constant 0 : index
      %c0_15 = arith.constant 0 : index
      %16 = vector.load %arg6[%c0_14, %c0_15] : memref<64x512xf32, #tpu.memory_space<vmem>>, vector<64x512xf32>
      tpu.vector_store %arg6[%c0_14, %c0_15], %15 {strides = array<i32>} : memref<64x512xf32, #tpu.memory_space<vmem>>, vector<64x512xf32>,
    } else {
    }
    return
  }
  func.func @transform_0(%arg0: i32, %arg1: i32, %arg2: i32) -> (i32, i32) {
    %c0_i32 = arith.constant 0 : i32
    return %arg0, %arg2 : i32, i32
  }
  func.func @transform_1(%arg0: i32, %arg1: i32, %arg2: i32) -> (i32, i32) {
    %c0_i32 = arith.constant 0 : i32
    return %arg2, %arg1 : i32, i32
  }
  func.func @transform_2(%arg0: i32, %arg1: i32, %arg2: i32) -> (i32, i32) {
    %c0_i32 = arith.constant 0 : i32
    %c0_i32_0 = arith.constant 0 : i32
    return %c0_i32, %arg1 : i32, i32
  }
  func.func @transform_3(%arg0: i32, %arg1: i32, %arg2: i32) -> (i32, i32) {
    %c0_i32 = arith.constant 0 : i32
    return %arg0, %arg1 : i32, i32
  }
}

</mosaic_0001>

<bundles_post_ra>
// kernel: decoder_rnn_forward.5
= control target key start
LH: loop header
LB: loop body
LE: loop exit
PB: predicated region body
PF: predicated region fallthrough
CT: control target
= control target key end

     0   :  { %vm19_vm0 = vcmask 261120   ;;  %v268_v5 = vmov 0.0   ;;  %s367_s0 = inlined_call_operand.vmem [shape: f32[16,128], index: 0, kind: input, shape index: {}]   ;;  %s368_s1 = inlined_call_operand.vmem [shape: f32[128,32], index: 1, kind: input, shape index: {}]   ;;  %s369_s2 = inlined_call_operand.vmem [shape: f32[1,32], index: 2, kind: input, shape index: {}]   ;;  %s370_s3 = inlined_call_operand.hbm [shape: f32[16,32], index: 3, kind: output, shape index: {}]  }
   0x1   :  { %v26_v0 = vld [vmem:[%s368_s1] sm:$0xff]  ;;  %v27_v1 = vld [vmem:[%s368_s1 + $0x8] sm:$0xff]  ;;  %v28_v2 = vld [vmem:[%s368_s1 + $0x10] sm:$0xff]  ;;  %21 = vst.msk [vmem:[#allocation2 + $0x8] sm:$0xff] %vm19_vm0, %v268_v5 }
   0x2   :  { %v208_v3 = vpack.c.bf16 %v27_v1, %v26_v0  ;;  %v29_v4 = vld [vmem:[%s368_s1 + $0x18] sm:$0xff]  ;;  %20 = vst.msk [vmem:[#allocation2] sm:$0xff] %vm19_vm0, %v268_v5  ;;  %v30_v7 = vld [vmem:[%s368_s1 + $0x20] sm:$0xff]  ;;  %v31_v8 = vld [vmem:[%s368_s1 + $0x28] sm:$0xff] }
   0x3   :  { %v212_v6 = vpack.c.bf16 %v29_v4, %v28_v2  ;;  %v216_v9 = vpack.c.bf16 %v31_v8, %v30_v7  ;;  %v24_v10 = vld [vmem:[%s367_s0] sm:$0xff]  ;;  %v32_v11 = vld [vmem:[%s368_s1 + $0x30] sm:$0xff]  ;;  %v33_v12 = vld [vmem:[%s368_s1 + $0x38] sm:$0xff] }
   0x4   :  { %209 = vmatprep.subr.bf16.mxu0 %v208_v3  ;;  %205 = vmatprep.mubr.f32.mxu0 %v24_v10 }
   0x5   :  { %211 = vmatpush3.bf16.msra.mxu0 %v208_v3 }
   0x6   :  { %213 = vmatprep.subr.bf16.mxu0 %v212_v6 }
   0x7   :  { %8 = vsyncpa [#allocation4], 0  ;;  %v220_v13 = vpack.c.bf16 %v33_v12, %v32_v11  ;;  %v34_v14 = vld [vmem:[%s368_s1 + $0x40] sm:$0xff]  ;;  %v35_v15 = vld [vmem:[%s368_s1 + $0x48] sm:$0xff]  ;;  %s269_s22 = smov [#allocation3]  }
   0x8   :  { %v224_v16 = vpack.c.bf16 %v35_v15, %v34_v14  ;;  %v36_v17 = vld [vmem:[%s368_s1 + $0x50] sm:$0xff]  ;;  %v37_v18 = vld [vmem:[%s368_s1 + $0x58] sm:$0xff]  ;;  %v38_v20 = vld [vmem:[%s368_s1 + $0x60] sm:$0xff]  ;;  %s143_s23 = sshll.u32 %s269_s22, 4  ;;  %s144_s23 = int_to_ptr.vmem [resolvable:$true] %s143_s23 }
   0x9   :  { %215 = vmatpush3.bf16.msra.mxu0 %v212_v6  ;;  %v228_v19 = vpack.c.bf16 %v37_v18, %v36_v17  ;;  %v39_v21 = vld [vmem:[%s368_s1 + $0x68] sm:$0xff]  ;;  %v40_v23 = vld [vmem:[%s368_s1 + $0x70] sm:$0xff]  ;;  %v41_v24 = vld [vmem:[%s368_s1 + $0x78] sm:$0xff]  ;;  %p249_p1 = scmp.lt.s32.totalorder %s144_s23, %s144_s23 }
   0xa   :  { %217 = vmatprep.subr.bf16.mxu0 %v216_v9  ;;  %v232_v22 = vpack.c.bf16 %v39_v21, %v38_v20  ;;  %v236_v25 = vpack.c.bf16 %v41_v24, %v40_v23  ;;  %v25_v26 = vld [vmem:[%s367_s0 + $0x8] sm:$0xff]  ;;  %v22_v28 = vld [vmem:[#allocation2] sm:$0xff]  ;;  %s244_s0 = scalar_lea.vmem %s144_s23, 256 }
   0xb   :  { %v23_v27 = vld [vmem:[#allocation2 + $0x8] sm:$0xff]  ;;  %v154_v33 = vld [vmem:[%s369_s2] ss:$0 sm:$0xff]  ;;  %p245_p0 = scmp.ne.s32.totalorder %s144_s23, %s244_s0  ;;  %p250_p2 = scmp.lt.s32.totalorder %s244_s0, %s244_s0 }
   0xd   :  { %219 = vmatpush3.bf16.msra.mxu0 %v216_v9  ;;  %p251_p3 = por %p250_p2, %p249_p1 }
   0xe   :  { %221 = vmatprep.subr.bf16.mxu0 %v220_v13 }
   0xf   :  { %p252_p4 = pnand %p251_p3, %p245_p0 }
  0x11   :  { %223 = vmatpush3.bf16.msra.mxu0 %v220_v13 }
  0x12   :  { %225 = vmatprep.subr.bf16.mxu0 %v224_v16 }
  0x15   :  { %227 = vmatpush3.bf16.msra.mxu0 %v224_v16 }
  0x16   :  { %229 = vmatprep.subr.bf16.mxu0 %v228_v19 }
  0x19   :  { %231 = vmatpush3.bf16.msra.mxu0 %v228_v19 }
  0x1a   :  { %233 = vmatprep.subr.bf16.mxu0 %v232_v22 }
  0x1d   :  { %235 = vmatpush3.bf16.msra.mxu0 %v232_v22 }
  0x1e   :  { %237 = vmatprep.subr.bf16.mxu0 %v236_v25 }
  0x21   :  { %239 = vmatpush3.bf16.msra.mxu0 %v236_v25 }
  0x24   :  { %206 = vmatmul.mubr.f32.vlgmr.msra.gmra.mrb[0].mxu0 %v25_v26 }
  0xf7   :  { %v207_v29 = vpop.f32.mrb[0].mxu0 }
  0xf8   :  { %v118_v30 = vadd.f32 %v207_v29, %v23_v27  ;;  %v108_v31 = vpop.f32.mrb[1].mxu0 }
  0xf9   :  { %v117_v32 = vadd.f32 %v108_v31, %v22_v28 }
  0xfa   :  { %121 = vst.msk [vmem:[#allocation2 + $0x8] sm:$0xff] %vm19_vm0, %v118_v30 }
  0xfb   :  { %120 = vst.msk [vmem:[#allocation2] sm:$0xff] %vm19_vm0, %v117_v32 }
 0x101   :  { %v126_v34 = vld [vmem:[#allocation2 + $0x8] sm:$0xff] }
 0x102   :  { %v125_v35 = vld [vmem:[#allocation2] sm:$0xff]  ;;  %v135_v36 = vadd.f32 %v154_v33, %v126_v34 }
 0x103   :  { %v134_v37 = vadd.f32 %v154_v33, %v125_v35 }
 0x104   :  { %137 = vst.msk [vmem:[#allocation3 + $0x8] sm:$0xff] %vm19_vm0, %v135_v36 }
 0x105   :  { %136 = vst.msk [vmem:[#allocation3] sm:$0xff] %vm19_vm0, %v134_v37 }
 0x106   :  { %255 = shalt.err (!%p252_p4)
}
 0x107   :  { %s256_s25 = scalar_lea.hbm %s370_s3, 256 }
 0x108   :  { %p257_p5 = scmp.ne.s32.totalorder %s370_s3, %s256_s25  ;;  %p260_p6 = scmp.lt.u32.totalorder %s256_s25, %s370_s3 }
 0x10a   :  { %p262_p7 = pnand %p260_p6, %p257_p5 }
 0x10c   :  { %265 = shalt.err (!%p262_p7)
}
 0x10d   :  { %s270_s30 = smov 128   ;;  %s271_s4 = smov 8  }
 0x10e   :  { %149 = dma.vmem_to_hbm [thread:$0]  %s144_s23, 256, %s370_s3, [#allocation4], %s270_s30, %s270_s30, %s271_s4  }
 0x10f   :  { %266 = dma.done.wait [#allocation4], 256  }
 0x110   :  { %267 = vsyncadd [#allocation4], 4294967040 }
 0x111   :  { %153 = vsyncpa [#allocation4], 1 }

// kernel: decoder_rnn_forward.3
= control target key start
LH: loop header
LB: loop body
LE: loop exit
PB: predicated region body
PF: predicated region fallthrough
CT: control target
= control target key end

     0   :  { %8 = vsyncpa [#allocation4], 0  ;;  %s676_s12 = smov [#allocation3]   ;;  %s891_s0 = inlined_call_operand.vmem [shape: f32[64,128], index: 0, kind: input, shape index: {}]   ;;  %s892_s1 = inlined_call_operand.hbm [shape: f32[128,512], index: 1, kind: input, shape index: {}]   ;;  %s893_s2 = inlined_call_operand.vmem [shape: f32[1,512], index: 2, kind: input, shape index: {}]   ;;  %s894_s3 = inlined_call_operand.vmem [shape: f32[64,512], index: 3, kind: output, shape index: {}]  }
   0x1   :  { %s16_s13 = sshll.u32 %s676_s12, 4  ;;  %s652_s16 = scalar_lea.hbm %s892_s1, 8192  ;;  %s17_s13 = int_to_ptr.vmem [resolvable:$true] %s16_s13 }
   0x2   :  { %p653_p0 = scmp.ne.s32.totalorder %s892_s1, %s652_s16  ;;  %p656_p1 = scmp.lt.u32.totalorder %s652_s16, %s892_s1 }
   0x4   :  { %p658_p2 = pnand %p656_p1, %p653_p0 }
   0x6   :  { %661 = shalt.err (!%p658_p2)
}
   0x7   :  { %s662_s21 = scalar_lea.vmem %s17_s13, 8192  ;;  %p667_p4 = scmp.lt.s32.totalorder %s17_s13, %s17_s13 }
   0x8   :  { %p663_p3 = scmp.ne.s32.totalorder %s17_s13, %s662_s21  ;;  %p668_p5 = scmp.lt.s32.totalorder %s662_s21, %s662_s21 }
   0xa   :  { %p669_p6 = por %p668_p5, %p667_p4 }
   0xc   :  { %p670_p7 = pnand %p669_p6, %p663_p3 }
   0xe   :  { %673 = shalt.err (!%p670_p7)
}
   0xf   :  { %s677_s22 = smov 512   ;;  %s678_s23 = smov 32  }
  0x10   :  { %22 = dma.hbm_to_vmem [thread:$0]  %s892_s1, 8192, %s17_s13, [#allocation4], %s677_s22, %s677_s22, %s678_s23  }
  0x11   :  { %674 = dma.done.wait [#allocation4], 8192  }
  0x12   :  { %675 = vsyncadd [#allocation4], 4294959104  ;;  %v679_v0 = vmov 0.0   ;;  %v105_v1 = vld [vmem:[#allocation3 + $0x8] sm:$0xff]  ;;  %v107_v3 = vld [vmem:[#allocation3 + $0x18] sm:$0xff] }
  0x13   :  { %232 = vmatprep.mubr.f32.mxu0 %v679_v0  ;;  %345 = vmatprep.mubr.f32.mxu1 %v679_v0  ;;  %v109_v2 = vld [vmem:[#allocation3 + $0x28] sm:$0xff]  ;;  %v111_v5 = vld [vmem:[#allocation3 + $0x38] sm:$0xff]  ;;  %v104_v6 = vld [vmem:[#allocation3] sm:$0xff] }
  0x14   :  { %v584_v4 = vpack.c.bf16 %v109_v2, %v105_v1  ;;  %v108_v7 = vld [vmem:[#allocation3 + $0x20] sm:$0xff]  ;;  %v616_v8 = vpack.c.bf16 %v111_v5, %v107_v3  ;;  %v106_v10 = vld [vmem:[#allocation3 + $0x10] sm:$0xff]  ;;  %v113_v12 = vld [vmem:[#allocation3 + $0x48] sm:$0xff] }
  0x15   :  { %v586_v9 = vpack.c.bf16 %v108_v7, %v104_v6  ;;  %v110_v11 = vld [vmem:[#allocation3 + $0x30] sm:$0xff]  ;;  %v117_v14 = vld [vmem:[#allocation3 + $0x68] sm:$0xff]  ;;  %v115_v15 = vld [vmem:[#allocation3 + $0x58] sm:$0xff] }
  0x16   :  { %585 = vmatprep.subr.bf16.mxu0 %v584_v4  ;;  %v618_v13 = vpack.c.bf16 %v110_v11, %v106_v10  ;;  %v119_v16 = vld [vmem:[#allocation3 + $0x78] sm:$0xff]  ;;  %617 = vmatprep.subr.bf16.mxu1 %v616_v8  ;;  %v588_v17 = vpack.c.bf16 %v117_v14, %v113_v12  ;;  %v112_v19 = vld [vmem:[#allocation3 + $0x40] sm:$0xff]  ;;  %v114_v21 = vld [vmem:[#allocation3 + $0x50] sm:$0xff] }
  0x17   :  { %587 = vmatpush1.bf16.msra.mxu0 %v586_v9  ;;  %v620_v18 = vpack.c.bf16 %v119_v16, %v115_v15  ;;  %v116_v20 = vld [vmem:[#allocation3 + $0x60] sm:$0xff]  ;;  %v118_v23 = vld [vmem:[#allocation3 + $0x70] sm:$0xff]  ;;  %v121_v24 = vld [vmem:[#allocation3 + $0x88] sm:$0xff] }
  0x18   :  { %619 = vmatpush1.bf16.msra.mxu1 %v618_v13  ;;  %v590_v22 = vpack.c.bf16 %v116_v20, %v112_v19  ;;  %v125_v25 = vld [vmem:[#allocation3 + $0xa8] sm:$0xff]  ;;  %589 = vmatprep.subr.bf16.mxu0 %v588_v17  ;;  %v622_v26 = vpack.c.bf16 %v118_v23, %v114_v21  ;;  %v123_v28 = vld [vmem:[#allocation3 + $0x98] sm:$0xff]  ;;  %v120_v30 = vld [vmem:[#allocation3 + $0x80] sm:$0xff] }
  0x19   :  { %621 = vmatprep.subr.bf16.mxu1 %v620_v18  ;;  %v592_v27 = vpack.c.bf16 %v125_v25, %v121_v24  ;;  %v127_v29 = vld [vmem:[#allocation3 + $0xb8] sm:$0xff]  ;;  %v124_v32 = vld [vmem:[#allocation3 + $0xa0] sm:$0xff]  ;;  %v122_v33 = vld [vmem:[#allocation3 + $0x90] sm:$0xff] }
  0x1a   :  { %v624_v31 = vpack.c.bf16 %v127_v29, %v123_v28  ;;  %v126_v34 = vld [vmem:[#allocation3 + $0xb0] sm:$0xff]  ;;  %v594_v35 = vpack.c.bf16 %v124_v32, %v120_v30  ;;  %v129_v36 = vld [vmem:[#allocation3 + $0xc8] sm:$0xff]  ;;  %v131_v38 = vld [vmem:[#allocation3 + $0xd8] sm:$0xff] }
  0x1b   :  { %591 = vmatpush1.bf16.msra.mxu0 %v590_v22  ;;  %v133_v37 = vld [vmem:[#allocation3 + $0xe8] sm:$0xff]  ;;  %v626_v39 = vpack.c.bf16 %v126_v34, %v122_v33  ;;  %v135_v41 = vld [vmem:[#allocation3 + $0xf8] sm:$0xff]  ;;  %v128_v42 = vld [vmem:[#allocation3 + $0xc0] sm:$0xff] }
  0x1c   :  { %623 = vmatpush1.bf16.msra.mxu1 %v622_v26  ;;  %593 = vmatprep.subr.bf16.mxu0 %v592_v27  ;;  %v596_v40 = vpack.c.bf16 %v133_v37, %v129_v36  ;;  %v132_v43 = vld [vmem:[#allocation3 + $0xe0] sm:$0xff]  ;;  %v628_v44 = vpack.c.bf16 %v135_v41, %v131_v38  ;;  %v130_v45 = vld [vmem:[#allocation3 + $0xd0] sm:$0xff]  ;;  %v137_v47 = vld [vmem:[#allocation3 + $0x108] sm:$0xff] }
  0x1d   :  { %625 = vmatprep.subr.bf16.mxu1 %v624_v31  ;;  %v134_v46 = vld [vmem:[#allocation3 + $0xf0] sm:$0xff]  ;;  %v141_v48 = vld [vmem:[#allocation3 + $0x128] sm:$0xff]  ;;  %v139_v49 = vld [vmem:[#allocation3 + $0x118] sm:$0xff]  ;;  %v598_v51 = vpack.c.bf16 %v132_v43, %v128_v42  ;;  %v495_v42 = vlaneseq }
  0x1e   :  { %v143_v50 = vld [vmem:[#allocation3 + $0x138] sm:$0xff]  ;;  %v630_v52 = vpack.c.bf16 %v134_v46, %v130_v45  ;;  %v600_v53 = vpack.c.bf16 %v141_v48, %v137_v47  ;;  %v136_v54 = vld [vmem:[#allocation3 + $0x100] sm:$0xff]  ;;  %v138_v56 = vld [vmem:[#allocation3 + $0x110] sm:$0xff] }
  0x1f   :  { %595 = vmatpush1.bf16.msra.mxu0 %v594_v35  ;;  %v140_v55 = vld [vmem:[#allocation3 + $0x120] sm:$0xff]  ;;  %v632_v57 = vpack.c.bf16 %v143_v50, %v139_v49  ;;  %v142_v58 = vld [vmem:[#allocation3 + $0x130] sm:$0xff]  ;;  %v145_v59 = vld [vmem:[#allocation3 + $0x148] sm:$0xff]  ;;  %v496_v43 = vshrl.u32 %v495_v42, 7 }
  0x20   :  { %627 = vmatpush1.bf16.msra.mxu1 %v626_v39  ;;  %597 = vmatprep.subr.bf16.mxu0 %v596_v40  ;;  %v149_v60 = vld [vmem:[#allocation3 + $0x168] sm:$0xff]  ;;  %v147_v61 = vld [vmem:[#allocation3 + $0x158] sm:$0xff]  ;;  %v602_v63 = vpack.c.bf16 %v140_v55, %v136_v54  ;;  %v634_v1 = vpack.c.bf16 %v142_v58, %v138_v56  ;;  %v144_v3 = vld [vmem:[#allocation3 + $0x140] sm:$0xff] }
  0x21   :  { %629 = vmatprep.subr.bf16.mxu1 %v628_v44  ;;  %v151_v62 = vld [vmem:[#allocation3 + $0x178] sm:$0xff]  ;;  %v604_v2 = vpack.c.bf16 %v149_v60, %v145_v59  ;;  %v148_v4 = vld [vmem:[#allocation3 + $0x160] sm:$0xff]  ;;  %v146_v5 = vld [vmem:[#allocation3 + $0x150] sm:$0xff]  ;;  %v497_v44 = vsub.s32 0, %v496_v43  ;;  %v505_v46 = vsub.s32 2, %v496_v43  ;;  %v501_v47 = vsub.s32 1, %v496_v43 }
  0x22   :  { %v636_v6 = vpack.c.bf16 %v151_v62, %v147_v61  ;;  %v150_v7 = vld [vmem:[#allocation3 + $0x170] sm:$0xff]  ;;  %v153_v8 = vld [vmem:[#allocation3 + $0x188] sm:$0xff]  ;;  %v155_v10 = vld [vmem:[#allocation3 + $0x198] sm:$0xff]  ;;  %v606_v12 = vpack.c.bf16 %v148_v4, %v144_v3  ;;  %v509_v48 = vsub.s32 3, %v496_v43 }
  0x23   :  { %599 = vmatpush1.bf16.msra.mxu0 %v598_v51  ;;  %v157_v9 = vld [vmem:[#allocation3 + $0x1a8] sm:$0xff]  ;;  %v159_v11 = vld [vmem:[#allocation3 + $0x1b8] sm:$0xff]  ;;  %v638_v13 = vpack.c.bf16 %v150_v7, %v146_v5  ;;  %v152_v15 = vld [vmem:[#allocation3 + $0x180] sm:$0xff] }
  0x24   :  { %631 = vmatpush1.bf16.msra.mxu1 %v630_v52  ;;  %601 = vmatprep.subr.bf16.mxu0 %v600_v53  ;;  %v608_v14 = vpack.c.bf16 %v157_v9, %v153_v8  ;;  %v156_v16 = vld [vmem:[#allocation3 + $0x1a0] sm:$0xff]  ;;  %v154_v17 = vld [vmem:[#allocation3 + $0x190] sm:$0xff]  ;;  %v640_v18 = vpack.c.bf16 %v159_v11, %v155_v10  ;;  %v161_v20 = vld [vmem:[#allocation3 + $0x1c8] sm:$0xff] }
  0x25   :  { %633 = vmatprep.subr.bf16.mxu1 %v632_v57  ;;  %v158_v19 = vld [vmem:[#allocation3 + $0x1b0] sm:$0xff]  ;;  %v165_v21 = vld [vmem:[#allocation3 + $0x1e8] sm:$0xff]  ;;  %v163_v22 = vld [vmem:[#allocation3 + $0x1d8] sm:$0xff]  ;;  %v610_v24 = vpack.c.bf16 %v156_v16, %v152_v15 }
  0x26   :  { %v167_v23 = vld [vmem:[#allocation3 + $0x1f8] sm:$0xff]  ;;  %v642_v25 = vpack.c.bf16 %v158_v19, %v154_v17  ;;  %v612_v26 = vpack.c.bf16 %v165_v21, %v161_v20  ;;  %v160_v27 = vld [vmem:[#allocation3 + $0x1c0] sm:$0xff]  ;;  %v162_v30 = vld [vmem:[#allocation3 + $0x1d0] sm:$0xff] }
  0x27   :  { %603 = vmatpush1.bf16.msra.mxu0 %v602_v63  ;;  %v164_v28 = vld [vmem:[#allocation3 + $0x1e0] sm:$0xff]  ;;  %v644_v29 = vpack.c.bf16 %v167_v23, %v163_v22  ;;  %v166_v31 = vld [vmem:[#allocation3 + $0x1f0] sm:$0xff]  ;;  %v97_v35 = vld [vmem:[%s891_s0 + $0x8] sm:$0xff] }
  0x28   :  { %635 = vmatpush1.bf16.msra.mxu1 %v634_v1  ;;  %605 = vmatprep.subr.bf16.mxu0 %v604_v2  ;;  %v614_v32 = vpack.c.bf16 %v164_v28, %v160_v27  ;;  %v646_v33 = vpack.c.bf16 %v166_v31, %v162_v30  ;;  %v96_v34 = vld [vmem:[%s891_s0] sm:$0xff]  ;;  %v98_v36 = vld [vmem:[%s891_s0 + $0x10] sm:$0xff]  ;;  %v99_v37 = vld [vmem:[%s891_s0 + $0x18] sm:$0xff] }
  0x29   :  { %637 = vmatprep.subr.bf16.mxu1 %v636_v6  ;;  %v100_v38 = vld [vmem:[%s891_s0 + $0x20] sm:$0xff]  ;;  %v101_v39 = vld [vmem:[%s891_s0 + $0x28] sm:$0xff]  ;;  %v102_v40 = vld [vmem:[%s891_s0 + $0x30] sm:$0xff] }
  0x2a   :  { %v103_v41 = vld [vmem:[%s891_s0 + $0x38] sm:$0xff]  ;;  %v493_v45 = vld [vmem:[%s893_s2] sm:$0xf] }
  0x2b   :  { %607 = vmatpush1.bf16.msra.mxu0 %v606_v12  ;;  %v755_v49 = vrot.slane %v493_v45, %v497_v44  ;;  %v757_v50 = vrot.slane %v493_v45, %v505_v46  ;;  %v759_v51 = vrot.slane %v493_v45, %v501_v47  ;;  %v761_v52 = vrot.slane %v493_v45, %v509_v48 }
  0x2c   :  { %639 = vmatpush1.bf16.msra.mxu1 %v638_v13  ;;  %609 = vmatprep.subr.bf16.mxu0 %v608_v14 }
  0x2d   :  { %641 = vmatprep.subr.bf16.mxu1 %v640_v18 }
  0x2f   :  { %611 = vmatpush1.bf16.msra.mxu0 %v610_v24 }
  0x30   :  { %643 = vmatpush1.bf16.msra.mxu1 %v642_v25  ;;  %613 = vmatprep.subr.bf16.mxu0 %v612_v26 }
  0x31   :  { %645 = vmatprep.subr.bf16.mxu1 %v644_v29 }
  0x33   :  { %615 = vmatpush1.bf16.msra.mxu0 %v614_v32 }
  0x34   :  { %647 = vmatpush1.bf16.msra.mxu1 %v646_v33 }
  0x36   :  { %233 = vmatmul.mubr.f32.vlgmr.msra.gmra.mrb[0].mxu0 %v96_v34 }
  0x37   :  { %346 = vmatmul.mubr.f32.vlgmr.msra.gmra.mrb[0].mxu1 %v96_v34  ;;  %238 = vmatprep.mubr.f32.mxu0 %v679_v0 }
  0x38   :  { %351 = vmatprep.mubr.f32.mxu1 %v679_v0 }
  0x3a   :  { %239 = vmatmul.mubr.f32.gmra.mrb[2].mxu0 %v97_v35 }
  0x3b   :  { %352 = vmatmul.mubr.f32.gmra.mrb[2].mxu1 %v97_v35  ;;  %244 = vmatprep.mubr.f32.mxu0 %v679_v0 }
  0x3c   :  { %357 = vmatprep.mubr.f32.mxu1 %v679_v0 }
  0x3e   :  { %245 = vmatmul.mubr.f32.gmra.mrb[4].mxu0 %v98_v36 }
  0x3f   :  { %358 = vmatmul.mubr.f32.gmra.mrb[4].mxu1 %v98_v36  ;;  %250 = vmatprep.mubr.f32.mxu0 %v679_v0 }
  0x40   :  { %363 = vmatprep.mubr.f32.mxu1 %v679_v0 }
  0x42   :  { %251 = vmatmul.mubr.f32.gmra.mrb[6].mxu0 %v99_v37 }
  0x43   :  { %364 = vmatmul.mubr.f32.gmra.mrb[6].mxu1 %v99_v37  ;;  %256 = vmatprep.mubr.f32.mxu0 %v679_v0 }
  0x44   :  { %369 = vmatprep.mubr.f32.mxu1 %v679_v0 }
  0x46   :  { %257 = vmatmul.mubr.f32.gmra.mrb[8].mxu0 %v100_v38 }
  0x47   :  { %370 = vmatmul.mubr.f32.gmra.mrb[8].mxu1 %v100_v38  ;;  %262 = vmatprep.mubr.f32.mxu0 %v679_v0 }
  0x48   :  { %375 = vmatprep.mubr.f32.mxu1 %v679_v0 }
  0x4a   :  { %263 = vmatmul.mubr.f32.gmra.mrb[10].mxu0 %v101_v39 }
  0x4b   :  { %376 = vmatmul.mubr.f32.gmra.mrb[10].mxu1 %v101_v39  ;;  %268 = vmatprep.mubr.f32.mxu0 %v679_v0 }
  0x4c   :  { %381 = vmatprep.mubr.f32.mxu1 %v679_v0 }
  0x4e   :  { %269 = vmatmul.mubr.f32.gmra.mrb[12].mxu0 %v102_v40 }
  0x4f   :  { %382 = vmatmul.mubr.f32.gmra.mrb[12].mxu1 %v102_v40  ;;  %274 = vmatprep.mubr.f32.mxu0 %v679_v0 }
  0x50   :  { %387 = vmatprep.mubr.f32.mxu1 %v679_v0 }
  0x52   :  { %275 = vmatmul.mubr.f32.gmra.mrb[14].mxu0 %v103_v41 }
  0x53   :  { %388 = vmatmul.mubr.f32.gmra.mrb[14].mxu1 %v103_v41 }
 0x109   :  { %v234_v0 = vpop.f32.mrb[0].mxu0 }
 0x10a   :  { %v515_v53 = vadd.f32 %v755_v49, %v234_v0  ;;  %v347_v54 = vpop.f32.mrb[0].mxu1  ;;  %v236_v55 = vpop.f32.mrb[1].mxu0 }
 0x10b   :  { %v517_v56 = vadd.f32 %v757_v50, %v347_v54  ;;  %v516_v57 = vadd.f32 %v759_v51, %v236_v55  ;;  %v349_v58 = vpop.f32.mrb[1].mxu1 }
 0x10c   :  { %547 = vst [vmem:[%s894_s3] sm:$0xff] %v515_v53  ;;  %v518_v59 = vadd.f32 %v761_v52, %v349_v58 }
 0x10d   :  { %549 = vst [vmem:[%s894_s3 + $0x10] sm:$0xff] %v517_v56  ;;  %548 = vst [vmem:[%s894_s3 + $0x8] sm:$0xff] %v516_v57  ;;  %v240_v60 = vpop.f32.mrb[2].mxu0 }
 0x10e   :  { %550 = vst [vmem:[%s894_s3 + $0x18] sm:$0xff] %v518_v59  ;;  %v519_v61 = vadd.f32 %v755_v49, %v240_v60  ;;  %v353_v62 = vpop.f32.mrb[2].mxu1  ;;  %v242_v63 = vpop.f32.mrb[3].mxu0 }
 0x10f   :  { %v521_v1 = vadd.f32 %v757_v50, %v353_v62  ;;  %v520_v2 = vadd.f32 %v759_v51, %v242_v63  ;;  %v355_v3 = vpop.f32.mrb[3].mxu1 }
 0x110   :  { %551 = vst [vmem:[%s894_s3 + $0x20] sm:$0xff] %v519_v61  ;;  %v522_v4 = vadd.f32 %v761_v52, %v355_v3 }
 0x111   :  { %553 = vst [vmem:[%s894_s3 + $0x30] sm:$0xff] %v521_v1  ;;  %552 = vst [vmem:[%s894_s3 + $0x28] sm:$0xff] %v520_v2  ;;  %v246_v5 = vpop.f32.mrb[4].mxu0 }
 0x112   :  { %554 = vst [vmem:[%s894_s3 + $0x38] sm:$0xff] %v522_v4  ;;  %v523_v6 = vadd.f32 %v755_v49, %v246_v5  ;;  %v359_v7 = vpop.f32.mrb[4].mxu1  ;;  %v248_v8 = vpop.f32.mrb[5].mxu0 }
 0x113   :  { %v525_v9 = vadd.f32 %v757_v50, %v359_v7  ;;  %v524_v10 = vadd.f32 %v759_v51, %v248_v8  ;;  %v361_v11 = vpop.f32.mrb[5].mxu1 }
 0x114   :  { %555 = vst [vmem:[%s894_s3 + $0x40] sm:$0xff] %v523_v6  ;;  %v526_v12 = vadd.f32 %v761_v52, %v361_v11 }
 0x115   :  { %557 = vst [vmem:[%s894_s3 + $0x50] sm:$0xff] %v525_v9  ;;  %556 = vst [vmem:[%s894_s3 + $0x48] sm:$0xff] %v524_v10  ;;  %v252_v13 = vpop.f32.mrb[6].mxu0 }
 0x116   :  { %558 = vst [vmem:[%s894_s3 + $0x58] sm:$0xff] %v526_v12  ;;  %v527_v14 = vadd.f32 %v755_v49, %v252_v13  ;;  %v365_v15 = vpop.f32.mrb[6].mxu1  ;;  %v254_v16 = vpop.f32.mrb[7].mxu0 }
 0x117   :  { %v529_v17 = vadd.f32 %v757_v50, %v365_v15  ;;  %v528_v18 = vadd.f32 %v759_v51, %v254_v16  ;;  %v367_v19 = vpop.f32.mrb[7].mxu1 }
 0x118   :  { %559 = vst [vmem:[%s894_s3 + $0x60] sm:$0xff] %v527_v14  ;;  %v530_v20 = vadd.f32 %v761_v52, %v367_v19 }
 0x119   :  { %561 = vst [vmem:[%s894_s3 + $0x70] sm:$0xff] %v529_v17  ;;  %560 = vst [vmem:[%s894_s3 + $0x68] sm:$0xff] %v528_v18  ;;  %v258_v21 = vpop.f32.mrb[8].mxu0 }
 0x11a   :  { %562 = vst [vmem:[%s894_s3 + $0x78] sm:$0xff] %v530_v20  ;;  %v531_v22 = vadd.f32 %v755_v49, %v258_v21  ;;  %v371_v23 = vpop.f32.mrb[8].mxu1  ;;  %v260_v24 = vpop.f32.mrb[9].mxu0 }
 0x11b   :  { %v533_v25 = vadd.f32 %v757_v50, %v371_v23  ;;  %v532_v26 = vadd.f32 %v759_v51, %v260_v24  ;;  %v373_v27 = vpop.f32.mrb[9].mxu1 }
 0x11c   :  { %563 = vst [vmem:[%s894_s3 + $0x80] sm:$0xff] %v531_v22  ;;  %v534_v28 = vadd.f32 %v761_v52, %v373_v27 }
 0x11d   :  { %565 = vst [vmem:[%s894_s3 + $0x90] sm:$0xff] %v533_v25  ;;  %564 = vst [vmem:[%s894_s3 + $0x88] sm:$0xff] %v532_v26  ;;  %v264_v29 = vpop.f32.mrb[10].mxu0 }
 0x11e   :  { %566 = vst [vmem:[%s894_s3 + $0x98] sm:$0xff] %v534_v28  ;;  %v535_v30 = vadd.f32 %v755_v49, %v264_v29  ;;  %v377_v31 = vpop.f32.mrb[10].mxu1  ;;  %v266_v32 = vpop.f32.mrb[11].mxu0 }
 0x11f   :  { %v537_v33 = vadd.f32 %v757_v50, %v377_v31  ;;  %v536_v34 = vadd.f32 %v759_v51, %v266_v32  ;;  %v379_v35 = vpop.f32.mrb[11].mxu1 }
 0x120   :  { %567 = vst [vmem:[%s894_s3 + $0xa0] sm:$0xff] %v535_v30  ;;  %v538_v36 = vadd.f32 %v761_v52, %v379_v35 }
 0x121   :  { %569 = vst [vmem:[%s894_s3 + $0xb0] sm:$0xff] %v537_v33  ;;  %568 = vst [vmem:[%s894_s3 + $0xa8] sm:$0xff] %v536_v34  ;;  %v270_v37 = vpop.f32.mrb[12].mxu0 }
 0x122   :  { %570 = vst [vmem:[%s894_s3 + $0xb8] sm:$0xff] %v538_v36  ;;  %v539_v38 = vadd.f32 %v755_v49, %v270_v37  ;;  %v383_v39 = vpop.f32.mrb[12].mxu1  ;;  %v272_v40 = vpop.f32.mrb[13].mxu0 }
 0x123   :  { %v541_v41 = vadd.f32 %v757_v50, %v383_v39  ;;  %v540_v42 = vadd.f32 %v759_v51, %v272_v40  ;;  %v385_v43 = vpop.f32.mrb[13].mxu1 }
 0x124   :  { %571 = vst [vmem:[%s894_s3 + $0xc0] sm:$0xff] %v539_v38  ;;  %v542_v44 = vadd.f32 %v761_v52, %v385_v43 }
 0x125   :  { %573 = vst [vmem:[%s894_s3 + $0xd0] sm:$0xff] %v541_v41  ;;  %572 = vst [vmem:[%s894_s3 + $0xc8] sm:$0xff] %v540_v42  ;;  %v276_v45 = vpop.f32.mrb[14].mxu0 }
 0x126   :  { %574 = vst [vmem:[%s894_s3 + $0xd8] sm:$0xff] %v542_v44  ;;  %v543_v46 = vadd.f32 %v755_v49, %v276_v45  ;;  %v389_v47 = vpop.f32.mrb[14].mxu1  ;;  %v278_v48 = vpop.f32.mrb[15].mxu0 }
 0x127   :  { %v545_v0 = vadd.f32 %v757_v50, %v389_v47  ;;  %v544_v53 = vadd.f32 %v759_v51, %v278_v48  ;;  %v391_v54 = vpop.f32.mrb[15].mxu1 }
 0x128   :  { %575 = vst [vmem:[%s894_s3 + $0xe0] sm:$0xff] %v543_v46  ;;  %v546_v55 = vadd.f32 %v761_v52, %v391_v54 }
 0x129   :  { %577 = vst [vmem:[%s894_s3 + $0xf0] sm:$0xff] %v545_v0  ;;  %576 = vst [vmem:[%s894_s3 + $0xe8] sm:$0xff] %v544_v53 }
 0x12a   :  { %578 = vst [vmem:[%s894_s3 + $0xf8] sm:$0xff] %v546_v55 }
 0x12b   :  { %583 = vsyncpa [#allocation4], 1 }

// kernel: decoder_rnn_forward.4
= control target key start
LH: loop header
LB: loop body
LE: loop exit
PB: predicated region body
PF: predicated region fallthrough
CT: control target
= control target key end

     0   :  { %v2111_v3 = vmov 0.0   ;;  %s2801_s1 = inlined_call_operand.vmem [shape: f32[128,512], index: 1, kind: input, shape index: {}]   ;;  %s2802_s0 = inlined_call_operand.vmem [shape: f32[8,8,512], index: 0, kind: input, shape index: {}]   ;;  %s2803_s2 = inlined_call_operand.vmem [shape: f32[8,8,128], index: 2, kind: output, shape index: {}]  }
   0x1   :  { %v18_v0 = vld [vmem:[%s2801_s1 + $0x8] sm:$0xff]  ;;  %v17_v2 = vld [vmem:[%s2801_s1] sm:$0xff]  ;;  %150 = vmatprep.mubr.f32.mxu0 %v2111_v3  ;;  %221 = vmatprep.mubr.f32.mxu1 %v2111_v3  ;;  %v20_v12 = vld [vmem:[%s2801_s1 + $0x18] sm:$0xff] }
   0x2   :  { %v22_v1 = vld [vmem:[%s2801_s1 + $0x28] sm:$0xff]  ;;  %v21_v5 = vld [vmem:[%s2801_s1 + $0x20] sm:$0xff]  ;;  %v24_v13 = vld [vmem:[%s2801_s1 + $0x38] sm:$0xff] }
   0x3   :  { %v2138_v4 = vpack.c.bf16 %v22_v1, %v18_v0  ;;  %v26_v6 = vld [vmem:[%s2801_s1 + $0x48] sm:$0xff]  ;;  %v2149_v8 = vpack.c.bf16 %v21_v5, %v17_v2  ;;  %v25_v10 = vld [vmem:[%s2801_s1 + $0x40] sm:$0xff]  ;;  %v19_v14 = vld [vmem:[%s2801_s1 + $0x10] sm:$0xff]  ;;  %v2175_v17 = vpack.c.bf16 %v24_v13, %v20_v12 }
   0x4   :  { %v30_v7 = vld [vmem:[%s2801_s1 + $0x68] sm:$0xff]  ;;  %v29_v11 = vld [vmem:[%s2801_s1 + $0x60] sm:$0xff]  ;;  %v23_v15 = vld [vmem:[%s2801_s1 + $0x30] sm:$0xff] }
   0x5   :  { %v2151_v9 = vpack.c.bf16 %v30_v7, %v26_v6  ;;  %1519 = vmatprep.subr.bf16.mxu0 %v2138_v4  ;;  %v2173_v16 = vpack.c.bf16 %v29_v11, %v25_v10  ;;  %v2177_v18 = vpack.c.bf16 %v23_v15, %v19_v14  ;;  %v34_v19 = vld [vmem:[%s2801_s1 + $0x88] sm:$0xff]  ;;  %v33_v21 = vld [vmem:[%s2801_s1 + $0x80] sm:$0xff]  ;;  %v28_v24 = vld [vmem:[%s2801_s1 + $0x58] sm:$0xff]  ;;  %1551 = vmatprep.subr.bf16.mxu1 %v2175_v17 }
   0x6   :  { %1521 = vmatpush1.bf16.msra.mxu0 %v2149_v8  ;;  %v38_v20 = vld [vmem:[%s2801_s1 + $0xa8] sm:$0xff]  ;;  %v37_v23 = vld [vmem:[%s2801_s1 + $0xa0] sm:$0xff]  ;;  %v32_v25 = vld [vmem:[%s2801_s1 + $0x78] sm:$0xff] }
   0x7   :  { %1523 = vmatprep.subr.bf16.mxu0 %v2151_v9  ;;  %v2189_v22 = vpack.c.bf16 %v38_v20, %v34_v19  ;;  %v2201_v26 = vpack.c.bf16 %v32_v25, %v28_v24  ;;  %v27_v27 = vld [vmem:[%s2801_s1 + $0x50] sm:$0xff]  ;;  %v42_v29 = vld [vmem:[%s2801_s1 + $0xc8] sm:$0xff]  ;;  %1553 = vmatpush1.bf16.msra.mxu1 %v2177_v18  ;;  %v2219_v32 = vpack.c.bf16 %v37_v23, %v33_v21  ;;  %v36_v33 = vld [vmem:[%s2801_s1 + $0x98] sm:$0xff] }
   0x8   :  { %v31_v28 = vld [vmem:[%s2801_s1 + $0x70] sm:$0xff]  ;;  %v46_v31 = vld [vmem:[%s2801_s1 + $0xe8] sm:$0xff]  ;;  %v40_v34 = vld [vmem:[%s2801_s1 + $0xb8] sm:$0xff] }
   0x9   :  { %v2213_v30 = vpack.c.bf16 %v31_v28, %v27_v27  ;;  %1555 = vmatprep.subr.bf16.mxu1 %v2201_v26  ;;  %v35_v35 = vld [vmem:[%s2801_s1 + $0x90] sm:$0xff]  ;;  %v2232_v36 = vpack.c.bf16 %v46_v31, %v42_v29  ;;  %v41_v37 = vld [vmem:[%s2801_s1 + $0xc0] sm:$0xff]  ;;  %v2240_v39 = vpack.c.bf16 %v40_v34, %v36_v33  ;;  %v50_v41 = vld [vmem:[%s2801_s1 + $0x108] sm:$0xff] }
   0xa   :  { %1525 = vmatpush1.bf16.msra.mxu0 %v2173_v16  ;;  %v45_v38 = vld [vmem:[%s2801_s1 + $0xe0] sm:$0xff]  ;;  %v39_v40 = vld [vmem:[%s2801_s1 + $0xb0] sm:$0xff]  ;;  %v54_v42 = vld [vmem:[%s2801_s1 + $0x128] sm:$0xff] }
   0xb   :  { %1527 = vmatprep.subr.bf16.mxu0 %v2189_v22  ;;  %v44_v43 = vld [vmem:[%s2801_s1 + $0xd8] sm:$0xff]  ;;  %1557 = vmatpush1.bf16.msra.mxu1 %v2213_v30  ;;  %v2255_v44 = vpack.c.bf16 %v39_v40, %v35_v35  ;;  %v2261_v46 = vpack.c.bf16 %v45_v38, %v41_v37  ;;  %v49_v47 = vld [vmem:[%s2801_s1 + $0x100] sm:$0xff]  ;;  %v43_v49 = vld [vmem:[%s2801_s1 + $0xd0] sm:$0xff]  ;;  %v2276_v51 = vpack.c.bf16 %v54_v42, %v50_v41 }
   0xc   :  { %v48_v45 = vld [vmem:[%s2801_s1 + $0xf8] sm:$0xff]  ;;  %1559 = vmatprep.subr.bf16.mxu1 %v2240_v39  ;;  %v47_v50 = vld [vmem:[%s2801_s1 + $0xf0] sm:$0xff]  ;;  %v53_v52 = vld [vmem:[%s2801_s1 + $0x120] sm:$0xff] }
   0xd   :  { %v2267_v48 = vpack.c.bf16 %v48_v45, %v44_v43  ;;  %v52_v53 = vld [vmem:[%s2801_s1 + $0x118] sm:$0xff]  ;;  %v58_v55 = vld [vmem:[%s2801_s1 + $0x148] sm:$0xff]  ;;  %v2294_v57 = vpack.c.bf16 %v47_v50, %v43_v49  ;;  %v2297_v58 = vpack.c.bf16 %v53_v52, %v49_v47  ;;  %v57_v59 = vld [vmem:[%s2801_s1 + $0x140] sm:$0xff] }
   0xe   :  { %1529 = vmatpush1.bf16.msra.mxu0 %v2219_v32  ;;  %v56_v54 = vld [vmem:[%s2801_s1 + $0x138] sm:$0xff]  ;;  %v62_v56 = vld [vmem:[%s2801_s1 + $0x168] sm:$0xff]  ;;  %v51_v61 = vld [vmem:[%s2801_s1 + $0x110] sm:$0xff] }
   0xf   :  { %1531 = vmatprep.subr.bf16.mxu0 %v2232_v36  ;;  %1561 = vmatpush1.bf16.msra.mxu1 %v2255_v44  ;;  %v2303_v60 = vpack.c.bf16 %v56_v54, %v52_v53  ;;  %v55_v62 = vld [vmem:[%s2801_s1 + $0x130] sm:$0xff]  ;;  %v2312_v63 = vpack.c.bf16 %v62_v56, %v58_v55  ;;  %v61_v0 = vld [vmem:[%s2801_s1 + $0x160] sm:$0xff]  ;;  %v60_v1 = vld [vmem:[%s2801_s1 + $0x158] sm:$0xff] }
  0x10   :  { %1563 = vmatprep.subr.bf16.mxu1 %v2267_v48  ;;  %v64_v2 = vld [vmem:[%s2801_s1 + $0x178] sm:$0xff]  ;;  %v66_v5 = vld [vmem:[%s2801_s1 + $0x188] sm:$0xff]  ;;  %v2330_v7 = vpack.c.bf16 %v55_v62, %v51_v61  ;;  %v2333_v10 = vpack.c.bf16 %v61_v0, %v57_v59  ;;  %v65_v11 = vld [vmem:[%s2801_s1 + $0x180] sm:$0xff] }
  0x11   :  { %v70_v6 = vld [vmem:[%s2801_s1 + $0x1a8] sm:$0xff]  ;;  %v2339_v12 = vpack.c.bf16 %v64_v2, %v60_v1  ;;  %v59_v13 = vld [vmem:[%s2801_s1 + $0x150] sm:$0xff]  ;;  %v69_v19 = vld [vmem:[%s2801_s1 + $0x1a0] sm:$0xff] }
  0x12   :  { %1533 = vmatpush1.bf16.msra.mxu0 %v2261_v46  ;;  %v63_v14 = vld [vmem:[%s2801_s1 + $0x170] sm:$0xff]  ;;  %v2348_v15 = vpack.c.bf16 %v70_v6, %v66_v5  ;;  %v68_v20 = vld [vmem:[%s2801_s1 + $0x198] sm:$0xff]  ;;  %v74_v23 = vld [vmem:[%s2801_s1 + $0x1c8] sm:$0xff]  ;;  %v2369_v27 = vpack.c.bf16 %v69_v19, %v65_v11 }
  0x13   :  { %1535 = vmatprep.subr.bf16.mxu0 %v2276_v51  ;;  %1565 = vmatpush1.bf16.msra.mxu1 %v2294_v57  ;;  %v72_v21 = vld [vmem:[%s2801_s1 + $0x1b8] sm:$0xff]  ;;  %v78_v24 = vld [vmem:[%s2801_s1 + $0x1e8] sm:$0xff]  ;;  %v2366_v25 = vpack.c.bf16 %v63_v14, %v59_v13  ;;  %v73_v28 = vld [vmem:[%s2801_s1 + $0x1c0] sm:$0xff] }
  0x14   :  { %1567 = vmatprep.subr.bf16.mxu1 %v2303_v60  ;;  %v2375_v29 = vpack.c.bf16 %v72_v21, %v68_v20  ;;  %v67_v31 = vld [vmem:[%s2801_s1 + $0x190] sm:$0xff]  ;;  %v2384_v34 = vpack.c.bf16 %v78_v24, %v74_v23  ;;  %v77_v35 = vld [vmem:[%s2801_s1 + $0x1e0] sm:$0xff]  ;;  %v76_v37 = vld [vmem:[%s2801_s1 + $0x1d8] sm:$0xff] }
  0x15   :  { %v71_v33 = vld [vmem:[%s2801_s1 + $0x1b0] sm:$0xff]  ;;  %v80_v38 = vld [vmem:[%s2801_s1 + $0x1f8] sm:$0xff]  ;;  %v2399_v41 = vpack.c.bf16 %v77_v35, %v73_v28  ;;  %v81_v49 = vld [vmem:[%s2802_s0] sm:$0xff] }
  0x16   :  { %1537 = vmatpush1.bf16.msra.mxu0 %v2297_v58  ;;  %v2396_v40 = vpack.c.bf16 %v71_v33, %v67_v31  ;;  %v2402_v42 = vpack.c.bf16 %v80_v38, %v76_v37  ;;  %v75_v43 = vld [vmem:[%s2801_s1 + $0x1d0] sm:$0xff]  ;;  %v82_v50 = vld [vmem:[%s2802_s0 + $0x8] sm:$0xff]  ;;  %v84_v2 = vld [vmem:[%s2802_s0 + $0x18] sm:$0xff] }
  0x17   :  { %1539 = vmatprep.subr.bf16.mxu0 %v2312_v63  ;;  %1569 = vmatpush1.bf16.msra.mxu1 %v2330_v7  ;;  %v79_v45 = vld [vmem:[%s2801_s1 + $0x1f0] sm:$0xff] }
  0x18   :  { %1571 = vmatprep.subr.bf16.mxu1 %v2339_v12  ;;  %v2412_v47 = vpack.c.bf16 %v79_v45, %v75_v43  ;;  %v83_v55 = vld [vmem:[%s2802_s0 + $0x10] sm:$0xff]  ;;  %v1483_v45 = vld [vmem:[%s2802_s0 + $0x20] sm:$0xff] }
  0x1a   :  { %1541 = vmatpush1.bf16.msra.mxu0 %v2333_v10 }
  0x1b   :  { %1543 = vmatprep.subr.bf16.mxu0 %v2348_v15  ;;  %1573 = vmatpush1.bf16.msra.mxu1 %v2366_v25 }
  0x1c   :  { %1575 = vmatprep.subr.bf16.mxu1 %v2375_v29 }
  0x1e   :  { %1545 = vmatpush1.bf16.msra.mxu0 %v2369_v27 }
  0x1f   :  { %1547 = vmatprep.subr.bf16.mxu0 %v2384_v34  ;;  %1577 = vmatpush1.bf16.msra.mxu1 %v2396_v40 }
  0x20   :  { %1579 = vmatprep.subr.bf16.mxu1 %v2402_v42 }
  0x22   :  { %1549 = vmatpush1.bf16.msra.mxu0 %v2399_v41 }
  0x23   :  { %1583 = vmatprep.subr.bf16.mxu0 %v2138_v4  ;;  %1581 = vmatpush1.bf16.msra.mxu1 %v2412_v47 }
  0x24   :  { %1615 = vmatprep.subr.bf16.mxu1 %v2175_v17 }
  0x25   :  { %151 = vmatmul.mubr.f32.vlgmr.msra.gmra.mrb[0].mxu0 %v2111_v3 }
  0x26   :  { %1585 = vmatpush1.bf16.msra.mxu0 %v2149_v8  ;;  %324 = vmatprep.mubr.f32.mxu0 %v2111_v3 }
  0x27   :  { %1587 = vmatprep.subr.bf16.mxu0 %v2151_v9  ;;  %222 = vmatmul.mubr.f32.vlgmr.msra.gmra.mrb[0].mxu1 %v2111_v3 }
  0x28   :  { %1617 = vmatpush1.bf16.msra.mxu1 %v2177_v18  ;;  %395 = vmatprep.mubr.f32.mxu1 %v2111_v3 }
  0x29   :  { %1619 = vmatprep.subr.bf16.mxu1 %v2201_v26 }
  0x2a   :  { %1589 = vmatpush1.bf16.msra.mxu0 %v2173_v16 }
  0x2b   :  { %1591 = vmatprep.subr.bf16.mxu0 %v2189_v22 }
  0x2c   :  { %1621 = vmatpush1.bf16.msra.mxu1 %v2213_v30 }
  0x2d   :  { %1623 = vmatprep.subr.bf16.mxu1 %v2240_v39 }
  0x2e   :  { %1593 = vmatpush1.bf16.msra.mxu0 %v2219_v32 }
  0x2f   :  { %1595 = vmatprep.subr.bf16.mxu0 %v2232_v36 }
  0x30   :  { %1625 = vmatpush1.bf16.msra.mxu1 %v2255_v44 }
  0x31   :  { %1627 = vmatprep.subr.bf16.mxu1 %v2267_v48 }
  0x32   :  { %1597 = vmatpush1.bf16.msra.mxu0 %v2261_v46 }
  0x33   :  { %1599 = vmatprep.subr.bf16.mxu0 %v2276_v51 }
  0x34   :  { %1629 = vmatpush1.bf16.msra.mxu1 %v2294_v57 }
  0x35   :  { %1631 = vmatprep.subr.bf16.mxu1 %v2303_v60 }
  0x36   :  { %1601 = vmatpush1.bf16.msra.mxu0 %v2297_v58 }
  0x37   :  { %1603 = vmatprep.subr.bf16.mxu0 %v2312_v63 }
  0x38   :  { %1633 = vmatpush1.bf16.msra.mxu1 %v2330_v7 }
  0x39   :  { %1635 = vmatprep.subr.bf16.mxu1 %v2339_v12 }
  0x3a   :  { %1605 = vmatpush1.bf16.msra.mxu0 %v2333_v10 }
  0x3b   :  { %1607 = vmatprep.subr.bf16.mxu0 %v2348_v15 }
  0x3c   :  { %1637 = vmatpush1.bf16.msra.mxu1 %v2366_v25 }
  0x3d   :  { %1639 = vmatprep.subr.bf16.mxu1 %v2375_v29 }
  0x3e   :  { %1609 = vmatpush1.bf16.msra.mxu0 %v2369_v27 }
  0x3f   :  { %1611 = vmatprep.subr.bf16.mxu0 %v2384_v34 }
  0x40   :  { %1641 = vmatpush1.bf16.msra.mxu1 %v2396_v40 }
  0x41   :  { %1643 = vmatprep.subr.bf16.mxu1 %v2402_v42 }
  0x42   :  { %1613 = vmatpush1.bf16.msra.mxu0 %v2399_v41 }
  0x43   :  { %1647 = vmatprep.subr.bf16.mxu0 %v2138_v4 }
  0x44   :  { %1645 = vmatpush1.bf16.msra.mxu1 %v2412_v47 }
  0x45   :  { %1679 = vmatprep.subr.bf16.mxu1 %v2175_v17 }
  0xf8   :  { %v152_v52 = vpop.f32.mrb[0].mxu0 }
  0xf9   :  { %v228_v53 = vadd.f32 %v152_v52, %v81_v49  ;;  %v154_v54 = vpop.f32.mrb[1].mxu0  ;;  %v1484_v49 = vld [vmem:[%s2802_s0 + $0x28] sm:$0xff] }
  0xfa   :  { %v229_v56 = vadd.f32 %v154_v54, %v82_v50  ;;  %v223_v61 = vpop.f32.mrb[0].mxu1 }
  0xfb   :  { %v232_v59 = vmul.f32 0.5, %v228_v53  ;;  %v230_v0 = vadd.f32 %v223_v61, %v83_v55  ;;  %v225_v1 = vpop.f32.mrb[1].mxu1 }
  0xfc   :  { %v236_v62 = vmul.f32 0.5, %v229_v56  ;;  %v231_v5 = vadd.f32 %v225_v1, %v84_v2  ;;  %v1485_v56 = vld [vmem:[%s2802_s0 + $0x30] sm:$0xff]  ;;  %v1486_v1 = vld [vmem:[%s2802_s0 + $0x38] sm:$0xff] }
  0xfd   :  { %2031 = vtanh.f32 %v232_v59 }
  0xfe   :  { %2033 = vtanh.f32 %v236_v62  ;;  %v241_v6 = vmul.f32 0.5, %v231_v5 }
  0xff   :  { %2035 = vtanh.f32 %v230_v0 }
 0x100   :  { %2037 = vtanh.f32 %v241_v6 }
 0x107   :  { %v2032_v11 = vpop.eup %2031 }
 0x108   :  { %v2034_v13 = vpop.eup %2033  ;;  %v234_v14 = vmul.f32 0.5, %v2032_v11 }
 0x109   :  { %v2036_v19 = vpop.eup %2035  ;;  %v238_v20 = vmul.f32 0.5, %v2034_v13 }
 0x10a   :  { %v235_v21 = vadd.f32 0.5, %v234_v14  ;;  %v2038_v33 = vpop.eup %2037 }
 0x10b   :  { %v239_v23 = vadd.f32 0.5, %v238_v20  ;;  %v243_v35 = vmul.f32 0.5, %v2038_v33 }
 0x10c   :  { %v247_v24 = vmul.f32 %v2036_v19, %v235_v21 }
 0x10d   :  { %v246_v28 = vmul.f32 0.0, %v239_v23  ;;  %v244_v37 = vadd.f32 0.5, %v243_v35 }
 0x10f   :  { %v2467_v31 = vadd.f32 %v247_v24, %v246_v28 }
 0x111   :  { %2039 = vtanh.f32 %v2467_v31 }
 0x11b   :  { %v2040_v38 = vpop.eup %2039 }
 0x11c   :  { %v250_v43 = vmul.f32 %v2040_v38, %v244_v37 }
 0x11e   :  { %253 = vst [vmem:[%s2803_s2] sm:$0xff] %v250_v43  ;;  %325 = vmatmul.mubr.f32.vlgmr.msra.gmra.mrb[2].mxu0 %v250_v43  ;;  %396 = vmatmul.mubr.f32.vlgmr.msra.gmra.mrb[2].mxu1 %v250_v43 }
 0x11f   :  { %1649 = vmatpush1.bf16.msra.mxu0 %v2149_v8  ;;  %1681 = vmatpush1.bf16.msra.mxu1 %v2177_v18 }
 0x120   :  { %1651 = vmatprep.subr.bf16.mxu0 %v2151_v9  ;;  %1683 = vmatprep.subr.bf16.mxu1 %v2201_v26 }
 0x121   :  { %499 = vmatprep.mubr.f32.mxu0 %v2111_v3  ;;  %570 = vmatprep.mubr.f32.mxu1 %v2111_v3 }
 0x123   :  { %1653 = vmatpush1.bf16.msra.mxu0 %v2173_v16  ;;  %1685 = vmatpush1.bf16.msra.mxu1 %v2213_v30 }
 0x124   :  { %1655 = vmatprep.subr.bf16.mxu0 %v2189_v22  ;;  %1687 = vmatprep.subr.bf16.mxu1 %v2240_v39 }
 0x127   :  { %1657 = vmatpush1.bf16.msra.mxu0 %v2219_v32  ;;  %1689 = vmatpush1.bf16.msra.mxu1 %v2255_v44 }
 0x128   :  { %1659 = vmatprep.subr.bf16.mxu0 %v2232_v36  ;;  %1691 = vmatprep.subr.bf16.mxu1 %v2267_v48 }
 0x12b   :  { %1661 = vmatpush1.bf16.msra.mxu0 %v2261_v46  ;;  %1693 = vmatpush1.bf16.msra.mxu1 %v2294_v57 }
 0x12c   :  { %1663 = vmatprep.subr.bf16.mxu0 %v2276_v51  ;;  %1695 = vmatprep.subr.bf16.mxu1 %v2303_v60 }
 0x12f   :  { %1665 = vmatpush1.bf16.msra.mxu0 %v2297_v58  ;;  %1697 = vmatpush1.bf16.msra.mxu1 %v2330_v7 }
 0x130   :  { %1667 = vmatprep.subr.bf16.mxu0 %v2312_v63  ;;  %1699 = vmatprep.subr.bf16.mxu1 %v2339_v12 }
 0x133   :  { %1669 = vmatpush1.bf16.msra.mxu0 %v2333_v10  ;;  %1701 = vmatpush1.bf16.msra.mxu1 %v2366_v25 }
 0x134   :  { %1671 = vmatprep.subr.bf16.mxu0 %v2348_v15  ;;  %1703 = vmatprep.subr.bf16.mxu1 %v2375_v29 }
 0x137   :  { %1673 = vmatpush1.bf16.msra.mxu0 %v2369_v27  ;;  %1705 = vmatpush1.bf16.msra.mxu1 %v2396_v40 }
 0x138   :  { %1675 = vmatprep.subr.bf16.mxu0 %v2384_v34  ;;  %1707 = vmatprep.subr.bf16.mxu1 %v2402_v42 }
 0x13b   :  { %1677 = vmatpush1.bf16.msra.mxu0 %v2399_v41  ;;  %1709 = vmatpush1.bf16.msra.mxu1 %v2412_v47 }
 0x13c   :  { %1711 = vmatprep.subr.bf16.mxu0 %v2138_v4  ;;  %1743 = vmatprep.subr.bf16.mxu1 %v2175_v17 }
 0x1f1   :  { %v326_v50 = vpop.f32.mrb[2].mxu0  ;;  %v397_v52 = vpop.f32.mrb[2].mxu1 }
 0x1f2   :  { %v402_v53 = vadd.f32 %v1483_v45, %v326_v50  ;;  %v328_v54 = vpop.f32.mrb[3].mxu0  ;;  %v399_v55 = vpop.f32.mrb[3].mxu1  ;;  %v404_v0 = vadd.f32 %v1485_v56, %v397_v52  ;;  %v1489_v45 = vld [vmem:[%s2802_s0 + $0x48] sm:$0xff] }
 0x1f3   :  { %v403_v59 = vadd.f32 %v1484_v49, %v328_v54  ;;  %v405_v2 = vadd.f32 %v1486_v1, %v399_v55  ;;  %v1490_v55 = vld [vmem:[%s2802_s0 + $0x50] sm:$0xff] }
 0x1f4   :  { %v406_v61 = vmul.f32 0.5, %v402_v53 }
 0x1f5   :  { %v410_v62 = vmul.f32 0.5, %v403_v59  ;;  %v415_v5 = vmul.f32 0.5, %v405_v2 }
 0x1f6   :  { %2041 = vtanh.f32 %v406_v61 }
 0x1f7   :  { %2043 = vtanh.f32 %v410_v62 }
 0x1f8   :  { %2045 = vtanh.f32 %v404_v0  ;;  %v1491_v0 = vld [vmem:[%s2802_s0 + $0x58] sm:$0xff] }
 0x1f9   :  { %2047 = vtanh.f32 %v415_v5 }
 0x200   :  { %v2042_v6 = vpop.eup %2041 }
 0x201   :  { %v2044_v11 = vpop.eup %2043  ;;  %v408_v13 = vmul.f32 0.5, %v2042_v6 }
 0x202   :  { %v412_v14 = vmul.f32 0.5, %v2044_v11  ;;  %v2046_v20 = vpop.eup %2045 }
 0x203   :  { %v409_v19 = vadd.f32 0.5, %v408_v13  ;;  %v2048_v33 = vpop.eup %2047 }
 0x204   :  { %v413_v21 = vadd.f32 0.5, %v412_v14  ;;  %v417_v35 = vmul.f32 0.5, %v2048_v33 }
 0x205   :  { %v421_v23 = vmul.f32 %v2046_v20, %v409_v19 }
 0x206   :  { %v420_v24 = vmul.f32 %v413_v21, %v2467_v31  ;;  %v418_v37 = vadd.f32 0.5, %v417_v35  ;;  %v1488_v31 = vld [vmem:[%s2802_s0 + $0x40] sm:$0xff] }
 0x208   :  { %v2520_v28 = vadd.f32 %v421_v23, %v420_v24 }
 0x20a   :  { %2049 = vtanh.f32 %v2520_v28 }
 0x214   :  { %v2050_v38 = vpop.eup %2049 }
 0x215   :  { %v424_v43 = vmul.f32 %v2050_v38, %v418_v37 }
 0x217   :  { %1487 = vst [vmem:[%s2803_s2 + $0x8] sm:$0xff] %v424_v43  ;;  %500 = vmatmul.mubr.f32.vlgmr.msra.gmra.mrb[4].mxu0 %v424_v43  ;;  %571 = vmatmul.mubr.f32.vlgmr.msra.gmra.mrb[4].mxu1 %v424_v43 }
 0x218   :  { %1713 = vmatpush1.bf16.msra.mxu0 %v2149_v8  ;;  %1745 = vmatpush1.bf16.msra.mxu1 %v2177_v18 }
 0x219   :  { %1715 = vmatprep.subr.bf16.mxu0 %v2151_v9  ;;  %1747 = vmatprep.subr.bf16.mxu1 %v2201_v26 }
 0x21a   :  { %674 = vmatprep.mubr.f32.mxu0 %v2111_v3  ;;  %745 = vmatprep.mubr.f32.mxu1 %v2111_v3 }
 0x21c   :  { %1717 = vmatpush1.bf16.msra.mxu0 %v2173_v16  ;;  %1749 = vmatpush1.bf16.msra.mxu1 %v2213_v30 }
 0x21d   :  { %1719 = vmatprep.subr.bf16.mxu0 %v2189_v22  ;;  %1751 = vmatprep.subr.bf16.mxu1 %v2240_v39 }
 0x220   :  { %1721 = vmatpush1.bf16.msra.mxu0 %v2219_v32  ;;  %1753 = vmatpush1.bf16.msra.mxu1 %v2255_v44 }
 0x221   :  { %1723 = vmatprep.subr.bf16.mxu0 %v2232_v36  ;;  %1755 = vmatprep.subr.bf16.mxu1 %v2267_v48 }
 0x224   :  { %1725 = vmatpush1.bf16.msra.mxu0 %v2261_v46  ;;  %1757 = vmatpush1.bf16.msra.mxu1 %v2294_v57 }
 0x225   :  { %1727 = vmatprep.subr.bf16.mxu0 %v2276_v51  ;;  %1759 = vmatprep.subr.bf16.mxu1 %v2303_v60 }
 0x228   :  { %1729 = vmatpush1.bf16.msra.mxu0 %v2297_v58  ;;  %1761 = vmatpush1.bf16.msra.mxu1 %v2330_v7 }
 0x229   :  { %1731 = vmatprep.subr.bf16.mxu0 %v2312_v63  ;;  %1763 = vmatprep.subr.bf16.mxu1 %v2339_v12 }
 0x22c   :  { %1733 = vmatpush1.bf16.msra.mxu0 %v2333_v10  ;;  %1765 = vmatpush1.bf16.msra.mxu1 %v2366_v25 }
 0x22d   :  { %1735 = vmatprep.subr.bf16.mxu0 %v2348_v15  ;;  %1767 = vmatprep.subr.bf16.mxu1 %v2375_v29 }
 0x230   :  { %1737 = vmatpush1.bf16.msra.mxu0 %v2369_v27  ;;  %1769 = vmatpush1.bf16.msra.mxu1 %v2396_v40 }
 0x231   :  { %1739 = vmatprep.subr.bf16.mxu0 %v2384_v34  ;;  %1771 = vmatprep.subr.bf16.mxu1 %v2402_v42 }
 0x234   :  { %1741 = vmatpush1.bf16.msra.mxu0 %v2399_v41  ;;  %1773 = vmatpush1.bf16.msra.mxu1 %v2412_v47 }
 0x235   :  { %1775 = vmatprep.subr.bf16.mxu0 %v2138_v4  ;;  %1807 = vmatprep.subr.bf16.mxu1 %v2175_v17 }
 0x2ea   :  { %v501_v49 = vpop.f32.mrb[4].mxu0  ;;  %v572_v50 = vpop.f32.mrb[4].mxu1 }
 0x2eb   :  { %v577_v52 = vadd.f32 %v1488_v31, %v501_v49  ;;  %v503_v53 = vpop.f32.mrb[5].mxu0  ;;  %v574_v54 = vpop.f32.mrb[5].mxu1  ;;  %v579_v62 = vadd.f32 %v1490_v55, %v572_v50  ;;  %v1494_v31 = vld [vmem:[%s2802_s0 + $0x68] sm:$0xff] }
 0x2ec   :  { %v578_v56 = vadd.f32 %v1489_v45, %v503_v53  ;;  %v580_v1 = vadd.f32 %v1491_v0, %v574_v54  ;;  %v1495_v54 = vld [vmem:[%s2802_s0 + $0x70] sm:$0xff] }
 0x2ed   :  { %v581_v59 = vmul.f32 0.5, %v577_v52 }
 0x2ee   :  { %v585_v61 = vmul.f32 0.5, %v578_v56  ;;  %v590_v2 = vmul.f32 0.5, %v580_v1 }
 0x2ef   :  { %2051 = vtanh.f32 %v581_v59 }
 0x2f0   :  { %2053 = vtanh.f32 %v585_v61 }
 0x2f1   :  { %2055 = vtanh.f32 %v579_v62  ;;  %v1496_v62 = vld [vmem:[%s2802_s0 + $0x78] sm:$0xff] }
 0x2f2   :  { %2057 = vtanh.f32 %v590_v2 }
 0x2f9   :  { %v2052_v5 = vpop.eup %2051 }
 0x2fa   :  { %v2054_v6 = vpop.eup %2053  ;;  %v583_v11 = vmul.f32 0.5, %v2052_v5 }
 0x2fb   :  { %v587_v13 = vmul.f32 0.5, %v2054_v6  ;;  %v2056_v19 = vpop.eup %2055 }
 0x2fc   :  { %v584_v14 = vadd.f32 0.5, %v583_v11  ;;  %v2058_v33 = vpop.eup %2057 }
 0x2fd   :  { %v588_v20 = vadd.f32 0.5, %v587_v13  ;;  %v592_v35 = vmul.f32 0.5, %v2058_v33 }
 0x2fe   :  { %v596_v21 = vmul.f32 %v2056_v19, %v584_v14 }
 0x2ff   :  { %v595_v23 = vmul.f32 %v588_v20, %v2520_v28  ;;  %v593_v37 = vadd.f32 0.5, %v592_v35  ;;  %v1493_v28 = vld [vmem:[%s2802_s0 + $0x60] sm:$0xff] }
 0x301   :  { %v2573_v24 = vadd.f32 %v596_v21, %v595_v23 }
 0x303   :  { %2059 = vtanh.f32 %v2573_v24 }
 0x30d   :  { %v2060_v38 = vpop.eup %2059 }
 0x30e   :  { %v599_v43 = vmul.f32 %v2060_v38, %v593_v37 }
 0x310   :  { %1492 = vst [vmem:[%s2803_s2 + $0x10] sm:$0xff] %v599_v43  ;;  %675 = vmatmul.mubr.f32.vlgmr.msra.gmra.mrb[6].mxu0 %v599_v43  ;;  %746 = vmatmul.mubr.f32.vlgmr.msra.gmra.mrb[6].mxu1 %v599_v43 }
 0x311   :  { %1777 = vmatpush1.bf16.msra.mxu0 %v2149_v8  ;;  %1809 = vmatpush1.bf16.msra.mxu1 %v2177_v18 }
 0x312   :  { %1779 = vmatprep.subr.bf16.mxu0 %v2151_v9  ;;  %1811 = vmatprep.subr.bf16.mxu1 %v2201_v26 }
 0x313   :  { %849 = vmatprep.mubr.f32.mxu0 %v2111_v3  ;;  %920 = vmatprep.mubr.f32.mxu1 %v2111_v3 }
 0x315   :  { %1781 = vmatpush1.bf16.msra.mxu0 %v2173_v16  ;;  %1813 = vmatpush1.bf16.msra.mxu1 %v2213_v30 }
 0x316   :  { %1783 = vmatprep.subr.bf16.mxu0 %v2189_v22  ;;  %1815 = vmatprep.subr.bf16.mxu1 %v2240_v39 }
 0x319   :  { %1785 = vmatpush1.bf16.msra.mxu0 %v2219_v32  ;;  %1817 = vmatpush1.bf16.msra.mxu1 %v2255_v44 }
 0x31a   :  { %1787 = vmatprep.subr.bf16.mxu0 %v2232_v36  ;;  %1819 = vmatprep.subr.bf16.mxu1 %v2267_v48 }
 0x31d   :  { %1789 = vmatpush1.bf16.msra.mxu0 %v2261_v46  ;;  %1821 = vmatpush1.bf16.msra.mxu1 %v2294_v57 }
 0x31e   :  { %1791 = vmatprep.subr.bf16.mxu0 %v2276_v51  ;;  %1823 = vmatprep.subr.bf16.mxu1 %v2303_v60 }
 0x321   :  { %1793 = vmatpush1.bf16.msra.mxu0 %v2297_v58  ;;  %1825 = vmatpush1.bf16.msra.mxu1 %v2330_v7 }
 0x322   :  { %1795 = vmatprep.subr.bf16.mxu0 %v2312_v63  ;;  %1827 = vmatprep.subr.bf16.mxu1 %v2339_v12 }
 0x325   :  { %1797 = vmatpush1.bf16.msra.mxu0 %v2333_v10  ;;  %1829 = vmatpush1.bf16.msra.mxu1 %v2366_v25 }
 0x326   :  { %1799 = vmatprep.subr.bf16.mxu0 %v2348_v15  ;;  %1831 = vmatprep.subr.bf16.mxu1 %v2375_v29 }
 0x329   :  { %1801 = vmatpush1.bf16.msra.mxu0 %v2369_v27  ;;  %1833 = vmatpush1.bf16.msra.mxu1 %v2396_v40 }
 0x32a   :  { %1803 = vmatprep.subr.bf16.mxu0 %v2384_v34  ;;  %1835 = vmatprep.subr.bf16.mxu1 %v2402_v42 }
 0x32d   :  { %1805 = vmatpush1.bf16.msra.mxu0 %v2399_v41  ;;  %1837 = vmatpush1.bf16.msra.mxu1 %v2412_v47 }
 0x32e   :  { %1839 = vmatprep.subr.bf16.mxu0 %v2138_v4  ;;  %1871 = vmatprep.subr.bf16.mxu1 %v2175_v17 }
 0x3e3   :  { %v676_v45 = vpop.f32.mrb[6].mxu0  ;;  %v747_v49 = vpop.f32.mrb[6].mxu1 }
 0x3e4   :  { %v752_v50 = vadd.f32 %v1493_v28, %v676_v45  ;;  %v678_v52 = vpop.f32.mrb[7].mxu0  ;;  %v749_v53 = vpop.f32.mrb[7].mxu1  ;;  %v754_v61 = vadd.f32 %v1495_v54, %v747_v49  ;;  %v1499_v28 = vld [vmem:[%s2802_s0 + $0x88] sm:$0xff] }
 0x3e5   :  { %v753_v55 = vadd.f32 %v1494_v31, %v678_v52  ;;  %v755_v0 = vadd.f32 %v1496_v62, %v749_v53  ;;  %v1500_v53 = vld [vmem:[%s2802_s0 + $0x90] sm:$0xff] }
 0x3e6   :  { %v756_v56 = vmul.f32 0.5, %v752_v50 }
 0x3e7   :  { %v760_v59 = vmul.f32 0.5, %v753_v55  ;;  %v765_v1 = vmul.f32 0.5, %v755_v0 }
 0x3e8   :  { %2061 = vtanh.f32 %v756_v56 }
 0x3e9   :  { %2063 = vtanh.f32 %v760_v59 }
 0x3ea   :  { %2065 = vtanh.f32 %v754_v61  ;;  %v1501_v61 = vld [vmem:[%s2802_s0 + $0x98] sm:$0xff] }
 0x3eb   :  { %2067 = vtanh.f32 %v765_v1 }
 0x3f2   :  { %v2062_v2 = vpop.eup %2061 }
 0x3f3   :  { %v2064_v5 = vpop.eup %2063  ;;  %v758_v6 = vmul.f32 0.5, %v2062_v2 }
 0x3f4   :  { %v762_v11 = vmul.f32 0.5, %v2064_v5  ;;  %v2066_v14 = vpop.eup %2065 }
 0x3f5   :  { %v759_v13 = vadd.f32 0.5, %v758_v6  ;;  %v2068_v33 = vpop.eup %2067 }
 0x3f6   :  { %v763_v19 = vadd.f32 0.5, %v762_v11  ;;  %v767_v35 = vmul.f32 0.5, %v2068_v33 }
 0x3f7   :  { %v771_v20 = vmul.f32 %v2066_v14, %v759_v13 }
 0x3f8   :  { %v770_v21 = vmul.f32 %v763_v19, %v2573_v24  ;;  %v768_v37 = vadd.f32 0.5, %v767_v35  ;;  %v1498_v24 = vld [vmem:[%s2802_s0 + $0x80] sm:$0xff] }
 0x3fa   :  { %v2626_v23 = vadd.f32 %v771_v20, %v770_v21 }
 0x3fc   :  { %2069 = vtanh.f32 %v2626_v23 }
 0x406   :  { %v2070_v38 = vpop.eup %2069 }
 0x407   :  { %v774_v43 = vmul.f32 %v2070_v38, %v768_v37 }
 0x409   :  { %1497 = vst [vmem:[%s2803_s2 + $0x18] sm:$0xff] %v774_v43  ;;  %850 = vmatmul.mubr.f32.vlgmr.msra.gmra.mrb[8].mxu0 %v774_v43  ;;  %921 = vmatmul.mubr.f32.vlgmr.msra.gmra.mrb[8].mxu1 %v774_v43 }
 0x40a   :  { %1841 = vmatpush1.bf16.msra.mxu0 %v2149_v8  ;;  %1873 = vmatpush1.bf16.msra.mxu1 %v2177_v18 }
 0x40b   :  { %1843 = vmatprep.subr.bf16.mxu0 %v2151_v9  ;;  %1875 = vmatprep.subr.bf16.mxu1 %v2201_v26 }
 0x40c   :  { %1024 = vmatprep.mubr.f32.mxu0 %v2111_v3  ;;  %1095 = vmatprep.mubr.f32.mxu1 %v2111_v3 }
 0x40e   :  { %1845 = vmatpush1.bf16.msra.mxu0 %v2173_v16  ;;  %1877 = vmatpush1.bf16.msra.mxu1 %v2213_v30 }
 0x40f   :  { %1847 = vmatprep.subr.bf16.mxu0 %v2189_v22  ;;  %1879 = vmatprep.subr.bf16.mxu1 %v2240_v39 }
 0x412   :  { %1849 = vmatpush1.bf16.msra.mxu0 %v2219_v32  ;;  %1881 = vmatpush1.bf16.msra.mxu1 %v2255_v44 }
 0x413   :  { %1851 = vmatprep.subr.bf16.mxu0 %v2232_v36  ;;  %1883 = vmatprep.subr.bf16.mxu1 %v2267_v48 }
 0x416   :  { %1853 = vmatpush1.bf16.msra.mxu0 %v2261_v46  ;;  %1885 = vmatpush1.bf16.msra.mxu1 %v2294_v57 }
 0x417   :  { %1855 = vmatprep.subr.bf16.mxu0 %v2276_v51  ;;  %1887 = vmatprep.subr.bf16.mxu1 %v2303_v60 }
 0x41a   :  { %1857 = vmatpush1.bf16.msra.mxu0 %v2297_v58  ;;  %1889 = vmatpush1.bf16.msra.mxu1 %v2330_v7 }
 0x41b   :  { %1859 = vmatprep.subr.bf16.mxu0 %v2312_v63  ;;  %1891 = vmatprep.subr.bf16.mxu1 %v2339_v12 }
 0x41e   :  { %1861 = vmatpush1.bf16.msra.mxu0 %v2333_v10  ;;  %1893 = vmatpush1.bf16.msra.mxu1 %v2366_v25 }
 0x41f   :  { %1863 = vmatprep.subr.bf16.mxu0 %v2348_v15  ;;  %1895 = vmatprep.subr.bf16.mxu1 %v2375_v29 }
 0x422   :  { %1865 = vmatpush1.bf16.msra.mxu0 %v2369_v27  ;;  %1897 = vmatpush1.bf16.msra.mxu1 %v2396_v40 }
 0x423   :  { %1867 = vmatprep.subr.bf16.mxu0 %v2384_v34  ;;  %1899 = vmatprep.subr.bf16.mxu1 %v2402_v42 }
 0x426   :  { %1869 = vmatpush1.bf16.msra.mxu0 %v2399_v41  ;;  %1901 = vmatpush1.bf16.msra.mxu1 %v2412_v47 }
 0x427   :  { %1903 = vmatprep.subr.bf16.mxu0 %v2138_v4  ;;  %1935 = vmatprep.subr.bf16.mxu1 %v2175_v17 }
 0x4dc   :  { %v851_v31 = vpop.f32.mrb[8].mxu0  ;;  %v922_v45 = vpop.f32.mrb[8].mxu1 }
 0x4dd   :  { %v927_v49 = vadd.f32 %v1498_v24, %v851_v31  ;;  %v853_v50 = vpop.f32.mrb[9].mxu0  ;;  %v924_v52 = vpop.f32.mrb[9].mxu1  ;;  %v929_v59 = vadd.f32 %v1500_v53, %v922_v45  ;;  %v1504_v24 = vld [vmem:[%s2802_s0 + $0xa8] sm:$0xff] }
 0x4de   :  { %v928_v54 = vadd.f32 %v1499_v28, %v853_v50  ;;  %v930_v62 = vadd.f32 %v1501_v61, %v924_v52  ;;  %v1505_v52 = vld [vmem:[%s2802_s0 + $0xb0] sm:$0xff] }
 0x4df   :  { %v931_v55 = vmul.f32 0.5, %v927_v49 }
 0x4e0   :  { %v935_v56 = vmul.f32 0.5, %v928_v54  ;;  %v940_v0 = vmul.f32 0.5, %v930_v62 }
 0x4e1   :  { %2071 = vtanh.f32 %v931_v55  ;;  %v1506_v55 = vld [vmem:[%s2802_s0 + $0xb8] sm:$0xff] }
 0x4e2   :  { %2073 = vtanh.f32 %v935_v56 }
 0x4e3   :  { %2075 = vtanh.f32 %v929_v59 }
 0x4e4   :  { %2077 = vtanh.f32 %v940_v0 }
 0x4eb   :  { %v2072_v1 = vpop.eup %2071 }
 0x4ec   :  { %v2074_v2 = vpop.eup %2073  ;;  %v933_v5 = vmul.f32 0.5, %v2072_v1 }
 0x4ed   :  { %v937_v6 = vmul.f32 0.5, %v2074_v2  ;;  %v2076_v13 = vpop.eup %2075 }
 0x4ee   :  { %v934_v11 = vadd.f32 0.5, %v933_v5  ;;  %v2078_v33 = vpop.eup %2077 }
 0x4ef   :  { %v938_v14 = vadd.f32 0.5, %v937_v6  ;;  %v942_v35 = vmul.f32 0.5, %v2078_v33 }
 0x4f0   :  { %v946_v19 = vmul.f32 %v2076_v13, %v934_v11 }
 0x4f1   :  { %v945_v20 = vmul.f32 %v938_v14, %v2626_v23  ;;  %v943_v37 = vadd.f32 0.5, %v942_v35  ;;  %v1503_v23 = vld [vmem:[%s2802_s0 + $0xa0] sm:$0xff] }
 0x4f3   :  { %v2679_v21 = vadd.f32 %v946_v19, %v945_v20 }
 0x4f5   :  { %2079 = vtanh.f32 %v2679_v21 }
 0x4ff   :  { %v2080_v38 = vpop.eup %2079 }
 0x500   :  { %v949_v43 = vmul.f32 %v2080_v38, %v943_v37 }
 0x502   :  { %1502 = vst [vmem:[%s2803_s2 + $0x20] sm:$0xff] %v949_v43  ;;  %1025 = vmatmul.mubr.f32.vlgmr.msra.gmra.mrb[10].mxu0 %v949_v43  ;;  %1096 = vmatmul.mubr.f32.vlgmr.msra.gmra.mrb[10].mxu1 %v949_v43 }
 0x503   :  { %1905 = vmatpush1.bf16.msra.mxu0 %v2149_v8  ;;  %1937 = vmatpush1.bf16.msra.mxu1 %v2177_v18 }
 0x504   :  { %1907 = vmatprep.subr.bf16.mxu0 %v2151_v9  ;;  %1939 = vmatprep.subr.bf16.mxu1 %v2201_v26 }
 0x505   :  { %1199 = vmatprep.mubr.f32.mxu0 %v2111_v3  ;;  %1270 = vmatprep.mubr.f32.mxu1 %v2111_v3 }
 0x507   :  { %1909 = vmatpush1.bf16.msra.mxu0 %v2173_v16  ;;  %1941 = vmatpush1.bf16.msra.mxu1 %v2213_v30 }
 0x508   :  { %1911 = vmatprep.subr.bf16.mxu0 %v2189_v22  ;;  %1943 = vmatprep.subr.bf16.mxu1 %v2240_v39 }
 0x50b   :  { %1913 = vmatpush1.bf16.msra.mxu0 %v2219_v32  ;;  %1945 = vmatpush1.bf16.msra.mxu1 %v2255_v44 }
 0x50c   :  { %1915 = vmatprep.subr.bf16.mxu0 %v2232_v36  ;;  %1947 = vmatprep.subr.bf16.mxu1 %v2267_v48 }
 0x50f   :  { %1917 = vmatpush1.bf16.msra.mxu0 %v2261_v46  ;;  %1949 = vmatpush1.bf16.msra.mxu1 %v2294_v57 }
 0x510   :  { %1919 = vmatprep.subr.bf16.mxu0 %v2276_v51  ;;  %1951 = vmatprep.subr.bf16.mxu1 %v2303_v60 }
 0x513   :  { %1921 = vmatpush1.bf16.msra.mxu0 %v2297_v58  ;;  %1953 = vmatpush1.bf16.msra.mxu1 %v2330_v7 }
 0x514   :  { %1923 = vmatprep.subr.bf16.mxu0 %v2312_v63  ;;  %1955 = vmatprep.subr.bf16.mxu1 %v2339_v12 }
 0x517   :  { %1925 = vmatpush1.bf16.msra.mxu0 %v2333_v10  ;;  %1957 = vmatpush1.bf16.msra.mxu1 %v2366_v25 }
 0x518   :  { %1927 = vmatprep.subr.bf16.mxu0 %v2348_v15  ;;  %1959 = vmatprep.subr.bf16.mxu1 %v2375_v29 }
 0x51b   :  { %1929 = vmatpush1.bf16.msra.mxu0 %v2369_v27  ;;  %1961 = vmatpush1.bf16.msra.mxu1 %v2396_v40 }
 0x51c   :  { %1931 = vmatprep.subr.bf16.mxu0 %v2384_v34  ;;  %1963 = vmatprep.subr.bf16.mxu1 %v2402_v42 }
 0x51f   :  { %1933 = vmatpush1.bf16.msra.mxu0 %v2399_v41  ;;  %1965 = vmatpush1.bf16.msra.mxu1 %v2412_v47 }
 0x520   :  { %1967 = vmatprep.subr.bf16.mxu0 %v2138_v4  ;;  %1999 = vmatprep.subr.bf16.mxu1 %v2175_v17 }
 0x5d5   :  { %v1026_v28 = vpop.f32.mrb[10].mxu0  ;;  %v1097_v31 = vpop.f32.mrb[10].mxu1 }
 0x5d6   :  { %v1102_v45 = vadd.f32 %v1503_v23, %v1026_v28  ;;  %v1028_v49 = vpop.f32.mrb[11].mxu0  ;;  %v1099_v50 = vpop.f32.mrb[11].mxu1  ;;  %v1104_v54 = vadd.f32 %v1505_v52, %v1097_v31  ;;  %v1515_v31 = vld [vmem:[%s2802_s0 + $0xf0] sm:$0xff] }
 0x5d7   :  { %v1103_v4 = vadd.f32 %v1504_v24, %v1028_v49  ;;  %v1105_v56 = vadd.f32 %v1506_v55, %v1099_v50 }
 0x5d8   :  { %v1106_v53 = vmul.f32 0.5, %v1102_v45 }
 0x5d9   :  { %v1110_v17 = vmul.f32 0.5, %v1103_v4  ;;  %v1115_v59 = vmul.f32 0.5, %v1105_v56  ;;  %v1516_v4 = vld [vmem:[%s2802_s0 + $0xf8] sm:$0xff] }
 0x5da   :  { %2081 = vtanh.f32 %v1106_v53 }
 0x5db   :  { %2083 = vtanh.f32 %v1110_v17 }
 0x5dc   :  { %2085 = vtanh.f32 %v1104_v54 }
 0x5dd   :  { %2087 = vtanh.f32 %v1115_v59 }
 0x5e4   :  { %v2082_v61 = vpop.eup %2081 }
 0x5e5   :  { %v2084_v62 = vpop.eup %2083  ;;  %v1108_v0 = vmul.f32 0.5, %v2082_v61 }
 0x5e6   :  { %v1112_v1 = vmul.f32 0.5, %v2084_v62  ;;  %v2086_v5 = vpop.eup %2085 }
 0x5e7   :  { %v1109_v2 = vadd.f32 0.5, %v1108_v0  ;;  %v2088_v19 = vpop.eup %2087 }
 0x5e8   :  { %v1113_v6 = vadd.f32 0.5, %v1112_v1  ;;  %v1117_v20 = vmul.f32 0.5, %v2088_v19 }
 0x5e9   :  { %v1121_v11 = vmul.f32 %v2086_v5, %v1109_v2 }
 0x5ea   :  { %v1120_v13 = vmul.f32 %v1113_v6, %v2679_v21  ;;  %v1118_v33 = vadd.f32 0.5, %v1117_v20  ;;  %v1514_v21 = vld [vmem:[%s2802_s0 + $0xe8] sm:$0xff] }
 0x5ec   :  { %v2732_v14 = vadd.f32 %v1121_v11, %v1120_v13 }
 0x5ee   :  { %2089 = vtanh.f32 %v2732_v14 }
 0x5f8   :  { %v2090_v35 = vpop.eup %2089 }
 0x5f9   :  { %v1124_v37 = vmul.f32 %v2090_v35, %v1118_v33 }
 0x5fb   :  { %1507 = vst [vmem:[%s2803_s2 + $0x28] sm:$0xff] %v1124_v37  ;;  %1200 = vmatmul.mubr.f32.vlgmr.msra.gmra.mrb[12].mxu0 %v1124_v37  ;;  %1271 = vmatmul.mubr.f32.vlgmr.msra.gmra.mrb[12].mxu1 %v1124_v37 }
 0x5fc   :  { %1969 = vmatpush1.bf16.msra.mxu0 %v2149_v8  ;;  %2001 = vmatpush1.bf16.msra.mxu1 %v2177_v18  ;;  %v1509_v8 = vld [vmem:[%s2802_s0 + $0xc8] sm:$0xff] }
 0x5fd   :  { %1971 = vmatprep.subr.bf16.mxu0 %v2151_v9  ;;  %2003 = vmatprep.subr.bf16.mxu1 %v2201_v26 }
 0x5fe   :  { %1374 = vmatprep.mubr.f32.mxu0 %v2111_v3  ;;  %1445 = vmatprep.mubr.f32.mxu1 %v2111_v3  ;;  %v1508_v3 = vld [vmem:[%s2802_s0 + $0xc0] sm:$0xff] }
 0x600   :  { %1973 = vmatpush1.bf16.msra.mxu0 %v2173_v16  ;;  %2005 = vmatpush1.bf16.msra.mxu1 %v2213_v30  ;;  %v1510_v30 = vld [vmem:[%s2802_s0 + $0xd0] sm:$0xff] }
 0x601   :  { %1975 = vmatprep.subr.bf16.mxu0 %v2189_v22  ;;  %2007 = vmatprep.subr.bf16.mxu1 %v2240_v39 }
 0x604   :  { %1977 = vmatpush1.bf16.msra.mxu0 %v2219_v32  ;;  %2009 = vmatpush1.bf16.msra.mxu1 %v2255_v44 }
 0x605   :  { %1979 = vmatprep.subr.bf16.mxu0 %v2232_v36  ;;  %2011 = vmatprep.subr.bf16.mxu1 %v2267_v48 }
 0x608   :  { %1981 = vmatpush1.bf16.msra.mxu0 %v2261_v46  ;;  %2013 = vmatpush1.bf16.msra.mxu1 %v2294_v57  ;;  %v1511_v46 = vld [vmem:[%s2802_s0 + $0xd8] sm:$0xff] }
 0x609   :  { %1983 = vmatprep.subr.bf16.mxu0 %v2276_v51  ;;  %2015 = vmatprep.subr.bf16.mxu1 %v2303_v60 }
 0x60c   :  { %1985 = vmatpush1.bf16.msra.mxu0 %v2297_v58  ;;  %2017 = vmatpush1.bf16.msra.mxu1 %v2330_v7 }
 0x60d   :  { %1987 = vmatprep.subr.bf16.mxu0 %v2312_v63  ;;  %2019 = vmatprep.subr.bf16.mxu1 %v2339_v12 }
 0x610   :  { %1989 = vmatpush1.bf16.msra.mxu0 %v2333_v10  ;;  %2021 = vmatpush1.bf16.msra.mxu1 %v2366_v25 }
 0x611   :  { %1991 = vmatprep.subr.bf16.mxu0 %v2348_v15  ;;  %2023 = vmatprep.subr.bf16.mxu1 %v2375_v29 }
 0x614   :  { %1993 = vmatpush1.bf16.msra.mxu0 %v2369_v27  ;;  %2025 = vmatpush1.bf16.msra.mxu1 %v2396_v40 }
 0x615   :  { %1995 = vmatprep.subr.bf16.mxu0 %v2384_v34  ;;  %2027 = vmatprep.subr.bf16.mxu1 %v2402_v42 }
 0x618   :  { %1997 = vmatpush1.bf16.msra.mxu0 %v2399_v41  ;;  %2029 = vmatpush1.bf16.msra.mxu1 %v2412_v47  ;;  %v1513_v47 = vld [vmem:[%s2802_s0 + $0xe0] sm:$0xff] }
 0x6ce   :  { %v1201_v9 = vpop.f32.mrb[12].mxu0  ;;  %v1272_v16 = vpop.f32.mrb[12].mxu1 }
 0x6cf   :  { %v1277_v18 = vadd.f32 %v1508_v3, %v1201_v9  ;;  %v1203_v22 = vpop.f32.mrb[13].mxu0  ;;  %v1274_v26 = vpop.f32.mrb[13].mxu1  ;;  %v1279_v44 = vadd.f32 %v1510_v30, %v1272_v16 }
 0x6d0   :  { %v1278_v32 = vadd.f32 %v1509_v8, %v1203_v22  ;;  %v1280_v48 = vadd.f32 %v1511_v46, %v1274_v26 }
 0x6d1   :  { %v1281_v36 = vmul.f32 0.5, %v1277_v18 }
 0x6d2   :  { %v1285_v39 = vmul.f32 0.5, %v1278_v32  ;;  %v1290_v51 = vmul.f32 0.5, %v1280_v48 }
 0x6d3   :  { %2091 = vtanh.f32 %v1281_v36 }
 0x6d4   :  { %2093 = vtanh.f32 %v1285_v39 }
 0x6d5   :  { %2095 = vtanh.f32 %v1279_v44 }
 0x6d6   :  { %2097 = vtanh.f32 %v1290_v51 }
 0x6dd   :  { %v2092_v57 = vpop.eup %2091 }
 0x6de   :  { %v2094_v58 = vpop.eup %2093  ;;  %v1283_v60 = vmul.f32 0.5, %v2092_v57 }
 0x6df   :  { %v1287_v63 = vmul.f32 0.5, %v2094_v58  ;;  %v2096_v10 = vpop.eup %2095 }
 0x6e0   :  { %v1284_v7 = vadd.f32 0.5, %v1283_v60  ;;  %v2098_v29 = vpop.eup %2097 }
 0x6e1   :  { %v1288_v12 = vadd.f32 0.5, %v1287_v63  ;;  %v1292_v34 = vmul.f32 0.5, %v2098_v29 }
 0x6e2   :  { %v1296_v15 = vmul.f32 %v2096_v10, %v1284_v7 }
 0x6e3   :  { %v1295_v25 = vmul.f32 %v1288_v12, %v2732_v14  ;;  %v1293_v40 = vadd.f32 0.5, %v1292_v34 }
 0x6e5   :  { %v1297_v27 = vadd.f32 %v1296_v15, %v1295_v25 }
 0x6e7   :  { %2099 = vtanh.f32 %v1297_v27 }
 0x6f1   :  { %v2100_v41 = vpop.eup %2099 }
 0x6f2   :  { %v1299_v42 = vmul.f32 %v2100_v41, %v1293_v40 }
 0x6f4   :  { %1512 = vst [vmem:[%s2803_s2 + $0x30] sm:$0xff] %v1299_v42  ;;  %1375 = vmatmul.mubr.f32.vlgmr.msra.gmra.mrb[14].mxu0 %v1299_v42  ;;  %1446 = vmatmul.mubr.f32.vlgmr.msra.gmra.mrb[14].mxu1 %v1299_v42 }
 0x7c7   :  { %v1376_v38 = vpop.f32.mrb[14].mxu0  ;;  %v1447_v43 = vpop.f32.mrb[14].mxu1 }
 0x7c8   :  { %v1452_v23 = vadd.f32 %v1513_v47, %v1376_v38  ;;  %v1378_v24 = vpop.f32.mrb[15].mxu0  ;;  %v1449_v28 = vpop.f32.mrb[15].mxu1  ;;  %v1454_v52 = vadd.f32 %v1515_v31, %v1447_v43 }
 0x7c9   :  { %v1453_v45 = vadd.f32 %v1514_v21, %v1378_v24  ;;  %v1455_v53 = vadd.f32 %v1516_v4, %v1449_v28 }
 0x7ca   :  { %v1456_v49 = vmul.f32 0.5, %v1452_v23 }
 0x7cb   :  { %v1460_v50 = vmul.f32 0.5, %v1453_v45  ;;  %v1465_v17 = vmul.f32 0.5, %v1455_v53 }
 0x7cc   :  { %2101 = vtanh.f32 %v1456_v49 }
 0x7cd   :  { %2103 = vtanh.f32 %v1460_v50 }
 0x7ce   :  { %2105 = vtanh.f32 %v1454_v52 }
 0x7cf   :  { %2107 = vtanh.f32 %v1465_v17 }
 0x7d6   :  { %v2102_v54 = vpop.eup %2101 }
 0x7d7   :  { %v2104_v55 = vpop.eup %2103  ;;  %v1458_v56 = vmul.f32 0.5, %v2102_v54 }
 0x7d8   :  { %v1462_v59 = vmul.f32 0.5, %v2104_v55  ;;  %v2106_v62 = vpop.eup %2105 }
 0x7d9   :  { %v1459_v61 = vadd.f32 0.5, %v1458_v56  ;;  %v2108_v6 = vpop.eup %2107 }
 0x7da   :  { %v1463_v0 = vadd.f32 0.5, %v1462_v59  ;;  %v1467_v11 = vmul.f32 0.5, %v2108_v6 }
 0x7db   :  { %v1471_v1 = vmul.f32 %v2106_v62, %v1459_v61 }
 0x7dc   :  { %v1470_v2 = vmul.f32 %v1463_v0, %v1297_v27  ;;  %v1468_v13 = vadd.f32 0.5, %v1467_v11 }
 0x7de   :  { %v1472_v5 = vadd.f32 %v1471_v1, %v1470_v2 }
 0x7e0   :  { %2109 = vtanh.f32 %v1472_v5 }
 0x7ea   :  { %v2110_v14 = vpop.eup %2109 }
 0x7eb   :  { %v1474_v19 = vmul.f32 %v2110_v14, %v1468_v13 }
 0x7ed   :  { %1517 = vst [vmem:[%s2803_s2 + $0x38] sm:$0xff] %v1474_v19 }

</bundles_post_ra>
